<compile_context>
chip_gen: v5e
topology: v5e:2x2
jax: 0.10.0
libtpu: 0.0.40
codegen_flags: <defaults>
</compile_context>

<pallas_src>
import jax
import jax.numpy as jnp
from jax.experimental import pallas as pl
from jax.experimental.pallas import tpu as pltpu

IN_DIM = 2080
HID_DIM = 256
OUT_DIM = 64
BN_EPS = 1e-5
NEG_SLOPE = 0.01        # nn.LeakyReLU() default
MAX_TB = 1024           # batch tile (rows); ~11 MiB peak VMEM with bf16 x
VMEM_LIMIT = 32 * 1024 * 1024


def _round_up(n, m):
    return ((n + m - 1) // m) * m


def _leaky(x):
    return jnp.where(x > 0, x, NEG_SLOPE * x)


def encoder3_kernel(x_ref, w1_ref, b1_ref, w2_ref, b2_ref, s2_ref, t2_ref, o_ref):
    # fc1: (TB, 2080) @ (2080, 256) on the MXU, bf16 inputs, f32 accumulation.
    # (x is already bf16 when the producer follows the contract; the astype is
    #  then a trace-time no-op.)
    h = jnp.dot(x_ref[...].astype(jnp.bfloat16), w1_ref[...],
                preferred_element_type=jnp.float32)
    h = _leaky(h + b1_ref[...])          # bias + LeakyReLU; dropout(eval) = id
    # BatchNorm1 is folded into w2/b2 in the wrapper (linear, feeds fc2 directly).

    # fc2: (TB, 256) @ (256, 64) on the MXU.
    h2 = jnp.dot(h.astype(jnp.bfloat16), w2_ref[...],
                 preferred_element_type=jnp.float32)
    h2 = _leaky(h2 + b2_ref[...])        # dropout(eval) = id
    # BatchNorm2 folded to per-feature scale/shift.
    o_ref[...] = (h2 * s2_ref[...] + t2_ref[...]).astype(o_ref.dtype)


def prepare_params(params):
    """Fold BN layers and cast weights to bf16; returns kernel-ready arrays."""
    (w1, b1, g1, beta1, rm1, rv1, w2, b2, g2, beta2, rm2, rv2) = params
    inv1 = g1 / jnp.sqrt(rv1 + BN_EPS)
    s1 = inv1                                   # BN1:  y = h*s1 + t1
    t1 = beta1 - rm1 * inv1
    # Fold BN1 into fc2:  (h*s1 + t1) @ w2 + b2 = h @ (s1[:,None]*w2) + (t1@w2 + b2)
    w2f = s1[:, None] * w2
    b2f = b2 + t1 @ w2
    inv2 = g2 / jnp.sqrt(rv2 + BN_EPS)
    s2 = inv2                                   # BN2:  y = z*s2 + t2
    t2 = beta2 - rm2 * inv2
    return (w1.astype(jnp.bfloat16),
            b1.reshape(1, HID_DIM).astype(jnp.float32),
            w2f.astype(jnp.bfloat16),
            b2f.reshape(1, OUT_DIM).astype(jnp.float32),
            s2.reshape(1, OUT_DIM).astype(jnp.float32),
            t2.reshape(1, OUT_DIM).astype(jnp.float32))


def _choose_tb(batch):
    """Sublane-aligned batch tile; keep >=2 grid steps for megacore when worthwhile."""
    tb = min(MAX_TB, _round_up(batch, 8))
    if batch >= 512 and pl.cdiv(batch, tb) < 2:
        tb = _round_up(pl.cdiv(batch, 2), 8)     # split across 2 TensorCores (v7x)
    return tb


def encoder3_forward(x, prepared):
    """x: (B, 2080), preferably bf16 (f32 accepted) -> (B, 64) in x.dtype."""
    B = x.shape[0]
    w1, b1, w2, b2, s2, t2 = prepared

    tb = _choose_tb(B)
    grid = (pl.cdiv(B, tb),)                  # ragged last block clipped by Pallas
    out_dtype = x.dtype

    const = lambda i: (0, 0)                  # weights/bias: VMEM-resident (one DMA)
    flops = 2 * B * (IN_DIM * HID_DIM + HID_DIM * OUT_DIM)
    bytes_accessed = (w1.size * 2 + w2.size * 2
                      + B * IN_DIM * x.dtype.itemsize
                      + B * OUT_DIM * jnp.dtype(out_dtype).itemsize
                      + (b1.size + b2.size + s2.size + t2.size) * 4)

    return pl.pallas_call(
        encoder3_kernel,
        out_shape=jax.ShapeDtypeStruct((B, OUT_DIM), out_dtype),
        grid=grid,
        in_specs=[
            pl.BlockSpec((tb, IN_DIM), lambda i: (i, 0)),     # x rows stream (bf16)
            pl.BlockSpec((IN_DIM, HID_DIM), const),           # w1 (bf16)
            pl.BlockSpec((1, HID_DIM), const),                # b1
            pl.BlockSpec((HID_DIM, OUT_DIM), const),          # w2 (BN1-folded, bf16)
            pl.BlockSpec((1, OUT_DIM), const),                # b2 (BN1-folded)
            pl.BlockSpec((1, OUT_DIM), const),                # BN2 scale
            pl.BlockSpec((1, OUT_DIM), const),                # BN2 shift
        ],
        out_specs=pl.BlockSpec((tb, OUT_DIM), lambda i: (i, 0)),
        compiler_params=pltpu.CompilerParams(
            dimension_semantics=("parallel",),
            vmem_limit_bytes=VMEM_LIMIT),
        cost_estimate=pl.CostEstimate(flops=flops, transcendentals=0,
                                      bytes_accessed=bytes_accessed),
    )(x, w1, b1, w2, b2, s2, t2)


def init_params(key):
    """Deterministic synthetic params matching PyTorch default inits (shapes)."""
    k1, k2, k3, k4 = jax.random.split(key, 4)
    # nn.Linear default: U(-1/sqrt(fan_in), 1/sqrt(fan_in)); W stored transposed.
    lim1 = 1.0 / jnp.sqrt(jnp.float32(IN_DIM))
    w1 = jax.random.uniform(k1, (IN_DIM, HID_DIM), jnp.float32, -lim1, lim1)
    b1 = jax.random.uniform(k2, (HID_DIM,), jnp.float32, -lim1, lim1)
    lim2 = 1.0 / jnp.sqrt(jnp.float32(HID_DIM))
    w2 = jax.random.uniform(k3, (HID_DIM, OUT_DIM), jnp.float32, -lim2, lim2)
    b2 = jax.random.uniform(k4, (OUT_DIM,), jnp.float32, -lim2, lim2)
    # nn.BatchNorm1d defaults: gamma=1, beta=0, running_mean=0, running_var=1
    g1 = jnp.ones((HID_DIM,), jnp.float32)
    beta1 = jnp.zeros((HID_DIM,), jnp.float32)
    rm1 = jnp.zeros((HID_DIM,), jnp.float32)
    rv1 = jnp.ones((HID_DIM,), jnp.float32)
    g2 = jnp.ones((OUT_DIM,), jnp.float32)
    beta2 = jnp.zeros((OUT_DIM,), jnp.float32)
    rm2 = jnp.zeros((OUT_DIM,), jnp.float32)
    rv2 = jnp.ones((OUT_DIM,), jnp.float32)
    return (w1, b1, g1, beta1, rm1, rv1, w2, b2, g2, beta2, rm2, rv2)


def reference_forward_f32(x, params):
    """Pure-f32 JAX reference with the original module semantics (eval mode)."""
    (w1, b1, g1, beta1, rm1, rv1, w2, b2, g2, beta2, rm2, rv2) = params
    h = x @ w1 + b1
    h = jnp.where(h > 0, h, NEG_SLOPE * h)
    h = g1 * (h - rm1) / jnp.sqrt(rv1 + BN_EPS) + beta1
    h = h @ w2 + b2
    h = jnp.where(h > 0, h, NEG_SLOPE * h)
    h = g2 * (h - rm2) / jnp.sqrt(rv2 + BN_EPS) + beta2
    return h


def reference_forward_bf16(x, prepared):
    """JAX reference mirroring the kernel's bf16/fold choices (tight check)."""
    w1, b1, w2, b2, s2, t2 = prepared
    h = jnp.dot(x.astype(jnp.bfloat16), w1, preferred_element_type=jnp.float32) + b1
    h = jnp.where(h > 0, h, NEG_SLOPE * h)
    h2 = jnp.dot(h.astype(jnp.bfloat16), w2, preferred_element_type=jnp.float32) + b2
    h2 = jnp.where(h2 > 0, h2, NEG_SLOPE * h2)
    return h2 * s2 + t2


if __name__ == "__main__":
    key = jax.random.PRNGKey(0)
    kx, kp = jax.random.split(key)
    B = 8
    x_f32 = jax.random.normal(kx, (B, IN_DIM), jnp.float32)
    # Upstream producer emits bf16 activations (kernel input contract).
    x = x_f32.astype(jnp.bfloat16)
    params = init_params(kp)
    prepared = prepare_params(params)

    out = encoder3_forward(x, prepared)
    jax.block_until_ready(out)
    assert out.shape == (B, OUT_DIM)
    out_f32 = out.astype(jnp.float32)

    # Tight check vs. a JAX reference using the same bf16 inputs / folds
    # (allow for bf16 output rounding of the kernel's result).
    ref_bf16 = reference_forward_bf16(x, prepared)
    assert jnp.allclose(out_f32, ref_bf16, atol=1e-2, rtol=1e-2)

    # Looser check vs. the exact f32 module semantics (bf16 x/weights/out rounding).
    ref_f32 = reference_forward_f32(x_f32, params)
    assert jnp.allclose(out_f32, ref_f32, atol=5e-2, rtol=5e-2)

    print("KERNEL_OK")
</pallas_src>

<mosaic_0001>
module attributes {stable_mosaic.version = 11 : i64} {
  func.func @encoder3_kernel(%arg0: i32, %arg1: memref<8x2080xbf16, #tpu.memory_space<vmem>>, %arg2: memref<2080x256xbf16, #tpu.memory_space<vmem>>, %arg3: memref<1x256xf32, #tpu.memory_space<vmem>>, %arg4: memref<256x64xbf16, #tpu.memory_space<vmem>>, %arg5: memref<1x64xf32, #tpu.memory_space<vmem>>, %arg6: memref<1x64xf32, #tpu.memory_space<vmem>>, %arg7: memref<1x64xf32, #tpu.memory_space<vmem>>, %arg8: memref<8x64xbf16, #tpu.memory_space<vmem>>) attributes {dimension_semantics = [#tpu.dimension_semantics<parallel>], iteration_bounds = array<i64: 1>, scalar_prefetch = 0 : i64, scratch_operands = 0 : i64, tpu.core_type = #tpu.core_type<tc>, window_params = [{transform_indices = @transform_0, window_bounds = array<i64: 8, 2080>}, {pipeline_mode = #tpu.pipeline_mode<synchronous>, transform_indices = @transform_1, window_bounds = array<i64: 2080, 256>}, {pipeline_mode = #tpu.pipeline_mode<synchronous>, transform_indices = @transform_2, window_bounds = array<i64: 1, 256>}, {pipeline_mode = #tpu.pipeline_mode<synchronous>, transform_indices = @transform_3, window_bounds = array<i64: 256, 64>}, {pipeline_mode = #tpu.pipeline_mode<synchronous>, transform_indices = @transform_4, window_bounds = array<i64: 1, 64>}, {pipeline_mode = #tpu.pipeline_mode<synchronous>, transform_indices = @transform_5, window_bounds = array<i64: 1, 64>}, {pipeline_mode = #tpu.pipeline_mode<synchronous>, transform_indices = @transform_6, window_bounds = array<i64: 1, 64>}, {transform_indices = @transform_7, window_bounds = array<i64: 8, 64>}]} {
    %c0 = arith.constant 0 : index
    %c0_0 = arith.constant 0 : index
    %0 = vector.load %arg1[%c0, %c0_0] : memref<8x2080xbf16, #tpu.memory_space<vmem>>, vector<8x2080xbf16>
    %c0_1 = arith.constant 0 : index
    %c0_2 = arith.constant 0 : index
    %1 = vector.load %arg2[%c0_1, %c0_2] : memref<2080x256xbf16, #tpu.memory_space<vmem>>, vector<2080x256xbf16>
    %cst = arith.constant dense<0.000000e+00> : vector<8x256xf32>
    %2 = tpu.matmul %0, %1, %cst {dimension_numbers = #tpu.dot_dimension_numbers<[1], [0], [0], [1], [0, 0, 1, 1], [], []>} : vector<8x2080xbf16>, vector<2080x256xbf16>, vector<8x256xf32> -> vector<8x256xf32>
    %c0_3 = arith.constant 0 : index
    %c0_4 = arith.constant 0 : index
    %3 = vector.load %arg3[%c0_3, %c0_4] : memref<1x256xf32, #tpu.memory_space<vmem>>, vector<1x256xf32>
    %4 = vector.broadcast %3 : vector<1x256xf32> to vector<8x256xf32>
    %5 = arith.addf %2, %4 : vector<8x256xf32>
    %cst_5 = arith.constant 0.000000e+00 : f32
    %6 = vector.broadcast %cst_5 : f32 to vector<8x256xf32>
    %7 = arith.cmpf ogt, %5, %6 : vector<8x256xf32>
    %cst_6 = arith.constant 0.00999999977 : f32
    %8 = vector.broadcast %cst_6 : f32 to vector<8x256xf32>
    %9 = arith.mulf %8, %5 : vector<8x256xf32>
    %10 = arith.select %7, %5, %9 : vector<8x256xi1>, vector<8x256xf32>
    %11 = arith.truncf %10 : vector<8x256xf32> to vector<8x256xbf16>
    %c0_7 = arith.constant 0 : index
    %c0_8 = arith.constant 0 : index
    %12 = vector.load %arg4[%c0_7, %c0_8] : memref<256x64xbf16, #tpu.memory_space<vmem>>, vector<256x64xbf16>
    %cst_9 = arith.constant dense<0.000000e+00> : vector<8x64xf32>
    %13 = tpu.matmul %11, %12, %cst_9 {dimension_numbers = #tpu.dot_dimension_numbers<[1], [0], [0], [1], [0, 0, 1, 1], [], []>} : vector<8x256xbf16>, vector<256x64xbf16>, vector<8x64xf32> -> vector<8x64xf32>
    %c0_10 = arith.constant 0 : index
    %c0_11 = arith.constant 0 : index
    %14 = vector.load %arg5[%c0_10, %c0_11] : memref<1x64xf32, #tpu.memory_space<vmem>>, vector<1x64xf32>
    %15 = vector.broadcast %14 : vector<1x64xf32> to vector<8x64xf32>
    %16 = arith.addf %13, %15 : vector<8x64xf32>
    %cst_12 = arith.constant 0.000000e+00 : f32
    %17 = vector.broadcast %cst_12 : f32 to vector<8x64xf32>
    %18 = arith.cmpf ogt, %16, %17 : vector<8x64xf32>
    %cst_13 = arith.constant 0.00999999977 : f32
    %19 = vector.broadcast %cst_13 : f32 to vector<8x64xf32>
    %20 = arith.mulf %19, %16 : vector<8x64xf32>
    %21 = arith.select %18, %16, %20 : vector<8x64xi1>, vector<8x64xf32>
    %c0_14 = arith.constant 0 : index
    %c0_15 = arith.constant 0 : index
    %22 = vector.load %arg6[%c0_14, %c0_15] : memref<1x64xf32, #tpu.memory_space<vmem>>, vector<1x64xf32>
    %23 = vector.broadcast %22 : vector<1x64xf32> to vector<8x64xf32>
    %24 = arith.mulf %21, %23 : vector<8x64xf32>
    %c0_16 = arith.constant 0 : index
    %c0_17 = arith.constant 0 : index
    %25 = vector.load %arg7[%c0_16, %c0_17] : memref<1x64xf32, #tpu.memory_space<vmem>>, vector<1x64xf32>
    %26 = vector.broadcast %25 : vector<1x64xf32> to vector<8x64xf32>
    %27 = arith.addf %24, %26 : vector<8x64xf32>
    %28 = arith.truncf %27 : vector<8x64xf32> to vector<8x64xbf16>
    %c0_18 = arith.constant 0 : index
    %c0_19 = arith.constant 0 : index
    %29 = vector.load %arg8[%c0_18, %c0_19] : memref<8x64xbf16, #tpu.memory_space<vmem>>, vector<8x64xbf16>
    tpu.vector_store %arg8[%c0_18, %c0_19], %28 {strides = array<i32>} : memref<8x64xbf16, #tpu.memory_space<vmem>>, vector<8x64xbf16>,
    return
  }
  func.func @transform_0(%arg0: i32) -> (i32, i32) {
    %c0_i32 = arith.constant 0 : i32
    %c0_i32_0 = arith.constant 0 : i32
    return %arg0, %c0_i32 : i32, i32
  }
  func.func @transform_1(%arg0: i32) -> (i32, i32) {
    %c0_i32 = arith.constant 0 : i32
    %c0_i32_0 = arith.constant 0 : i32
    %c0_i32_1 = arith.constant 0 : i32
    return %c0_i32, %c0_i32_0 : i32, i32
  }
  func.func @transform_2(%arg0: i32) -> (i32, i32) {
    %c0_i32 = arith.constant 0 : i32
    %c0_i32_0 = arith.constant 0 : i32
    %c0_i32_1 = arith.constant 0 : i32
    return %c0_i32, %c0_i32_0 : i32, i32
  }
  func.func @transform_3(%arg0: i32) -> (i32, i32) {
    %c0_i32 = arith.constant 0 : i32
    %c0_i32_0 = arith.constant 0 : i32
    %c0_i32_1 = arith.constant 0 : i32
    return %c0_i32, %c0_i32_0 : i32, i32
  }
  func.func @transform_4(%arg0: i32) -> (i32, i32) {
    %c0_i32 = arith.constant 0 : i32
    %c0_i32_0 = arith.constant 0 : i32
    %c0_i32_1 = arith.constant 0 : i32
    return %c0_i32, %c0_i32_0 : i32, i32
  }
  func.func @transform_5(%arg0: i32) -> (i32, i32) {
    %c0_i32 = arith.constant 0 : i32
    %c0_i32_0 = arith.constant 0 : i32
    %c0_i32_1 = arith.constant 0 : i32
    return %c0_i32, %c0_i32_0 : i32, i32
  }
  func.func @transform_6(%arg0: i32) -> (i32, i32) {
    %c0_i32 = arith.constant 0 : i32
    %c0_i32_0 = arith.constant 0 : i32
    %c0_i32_1 = arith.constant 0 : i32
    return %c0_i32, %c0_i32_0 : i32, i32
  }
  func.func @transform_7(%arg0: i32) -> (i32, i32) {
    %c0_i32 = arith.constant 0 : i32
    %c0_i32_0 = arith.constant 0 : i32
    return %arg0, %c0_i32 : i32, i32
  }
}

</mosaic_0001>

<bundles_post_ra>
// kernel: tpu_custom_call.1
= control target key start
LH: loop header
LB: loop body
LE: loop exit
PB: predicated region body
PF: predicated region fallthrough
CT: control target
= control target key end

     0   :  { %12 = vsyncpa [#allocation3], 0  ;;  %s4185_s0 = inlined_call_operand.hbm [shape: bf16[8,2080], index: 0, kind: input, shape index: {}]   ;;  %s4186_s1 = inlined_call_operand.hbm [shape: bf16[2080,256], index: 1, kind: input, shape index: {}]   ;;  %s4187_s2 = inlined_call_operand.hbm [shape: f32[1,256], index: 2, kind: input, shape index: {}]   ;;  %s4188_s3 = inlined_call_operand.vmem [shape: bf16[256,64], index: 3, kind: input, shape index: {}]   ;;  %s4189_s4 = inlined_call_operand.hbm [shape: f32[1,64], index: 4, kind: input, shape index: {}]   ;;  %s4190_s5 = inlined_call_operand.hbm [shape: f32[1,64], index: 5, kind: input, shape index: {}]   ;;  %s4191_s6 = inlined_call_operand.hbm [shape: f32[1,64], index: 6, kind: input, shape index: {}]   ;;  %s4192_s7 = inlined_call_operand.hbm [shape: bf16[8,64], index: 7, kind: output, shape index: {}]  }
   0x1   :  { %13 = vsyncpa [#allocation6], 0 }
   0x2   :  { %14 = vsyncpa [#allocation9], 0 }
   0x3   :  { %15 = vsyncpa [#allocation12], 0  ;;  %s32_s26 = sshll.u32 %s4186_s1, 4  ;;  %s33_s26 = int_to_ptr.hbm [resolvable:$true] %s32_s26 }
   0x4   :  { %16 = vsyncpa [#allocation4], 0  ;;  %s3966_s27 = smov [#allocation5]   ;;  %s59_s8 = sshll.u32 %s4189_s4, 4  ;;  %s60_s8 = int_to_ptr.hbm [resolvable:$true] %s59_s8 }
   0x5   :  { %s34_s28 = sshll.u32 %s3966_s27, 4  ;;  %s3967_s9 = smov 128   ;;  %s35_s28 = int_to_ptr.vmem [resolvable:$true] %s34_s28 }
   0x6   :  { %s3968_s10 = smov 8   ;;  %s3969_s11 = smov [#allocation8]  }
   0x7   :  { %40 = dma.hbm_to_vmem [thread:$0]  %s33_s26, 33280, %s35_s28, [#allocation6], %s3967_s9, %s3967_s9, %s3968_s10  }
   0x8   :  { %s61_s12 = sshll.u32 %s3969_s11, 4  ;;  %s22_s15 = sshll.u32 %s4185_s0, 4  ;;  %s62_s12 = int_to_ptr.vmem [resolvable:$true] %s61_s12  ;;  %s23_s15 = int_to_ptr.hbm [resolvable:$true] %s22_s15 }
   0x9   :  { %64 = dma.hbm_to_vmem [thread:$0]  %s60_s8, 16, %s62_s12, [#allocation9]  }
   0xa   :  { %s46_s17 = sshll.u32 %s4187_s2, 4  ;;  %s3970_s18 = smov [#allocation2]   ;;  %s47_s17 = int_to_ptr.hbm [resolvable:$true] %s46_s17 }
   0xb   :  { %s24_s19 = sshll.u32 %s3970_s18, 4  ;;  %s3971_s4 = smov [#allocation7]   ;;  %s25_s19 = int_to_ptr.vmem [resolvable:$true] %s24_s19 }
   0xc   :  { %27 = dma.hbm_to_vmem [thread:$0]  %s23_s15, 1088, %s25_s19, [#allocation3]  }
   0xd   :  { %s48_s20 = sshll.u32 %s3971_s4, 4  ;;  %s70_s23 = sshll.u32 %s4190_s5, 4  ;;  %s49_s20 = int_to_ptr.vmem [resolvable:$true] %s48_s20  ;;  %s71_s23 = int_to_ptr.hbm [resolvable:$true] %s70_s23 }
   0xe   :  { %51 = dma.hbm_to_vmem [thread:$0]  %s47_s17, 32, %s49_s20, [#allocation6]  }
   0xf   :  { %s81_s25 = sshll.u32 %s4191_s6, 4  ;;  %s3972_s26 = smov [#allocation10]   ;;  %s82_s25 = int_to_ptr.hbm [resolvable:$true] %s81_s25 }
  0x10   :  { %s72_s2 = sshll.u32 %s3972_s26, 4  ;;  %s3973_s27 = smov [#allocation11]   ;;  %s73_s2 = int_to_ptr.vmem [resolvable:$true] %s72_s2 }
  0x11   :  { %75 = dma.hbm_to_vmem [thread:$0]  %s71_s23, 16, %s73_s2, [#allocation9]  }
  0x12   :  { %s83_s28 = sshll.u32 %s3973_s27, 4  ;;  %s84_s28 = int_to_ptr.vmem [resolvable:$true] %s83_s28 }
  0x13   :  { %86 = dma.hbm_to_vmem [thread:$0]  %s82_s25, 16, %s84_s28, [#allocation12]  }
  0x14   :  { %3956 = dma.done.wait [#allocation3], 1088  }
  0x15   :  { %3957 = vsyncadd [#allocation3], 4294966208 }
  0x16   :  { %3958 = dma.done.wait [#allocation6], 33312  }
  0x17   :  { %3959 = vsyncadd [#allocation6], 4294933984 }
  0x18   :  { %3960 = dma.done.wait [#allocation9], 32  }
  0x19   :  { %3961 = vsyncadd [#allocation9], 4294967264 }
  0x1a   :  { %3962 = dma.done.wait [#allocation12], 16  }
  0x1b   :  { %3963 = vsyncadd [#allocation12], 4294967280  ;;  %v2452_v0 = vld [vmem:[#allocation5 + $0x70] sm:$0xf]  ;;  %v3515_v1 = vld [vmem:[#allocation5 + $0x74] sm:$0xf0] }
  0x1c   :  { %v2516_v2 = vld [vmem:[#allocation5 + $0xf0] sm:$0xf]  ;;  %v2453_v3 = vor.u32 %v3515_v1, %v2452_v0  ;;  %v3531_v4 = vld [vmem:[#allocation5 + $0xf4] sm:$0xf0]  ;;  %v2444_v11 = vld [vmem:[#allocation5 + $0x60] sm:$0xf] }
  0x1d   :  { %v2580_v5 = vld [vmem:[#allocation5 + $0x170] sm:$0xf]  ;;  %v3547_v6 = vld [vmem:[#allocation5 + $0x174] sm:$0xf0]  ;;  %v2517_v7 = vor.u32 %v3531_v4, %v2516_v2  ;;  %v3513_v13 = vld [vmem:[#allocation5 + $0x64] sm:$0xf0] }
  0x1e   :  { %v2581_v8 = vor.u32 %v3547_v6, %v2580_v5  ;;  %v2644_v9 = vld [vmem:[#allocation5 + $0x1f0] sm:$0xf]  ;;  %v3563_v10 = vld [vmem:[#allocation5 + $0x1f4] sm:$0xf0]  ;;  %1750 = vmatpush.bf16.msra.mxu0 %v2453_v3  ;;  %v2508_v14 = vld [vmem:[#allocation5 + $0xe0] sm:$0xf]  ;;  %v2445_v16 = vor.u32 %v3513_v13, %v2444_v11 }
  0x1f   :  { %v2645_v12 = vor.u32 %v3563_v10, %v2644_v9  ;;  %v3529_v15 = vld [vmem:[#allocation5 + $0xe4] sm:$0xf0]  ;;  %1763 = vmatpush.bf16.msra.mxu1 %v2517_v7  ;;  %v2572_v18 = vld [vmem:[#allocation5 + $0x160] sm:$0xf]  ;;  %v2436_v23 = vld [vmem:[#allocation5 + $0x50] sm:$0xf] }
  0x20   :  { %1776 = vmatpush.bf16.msra.mxu2 %v2581_v8  ;;  %v2509_v17 = vor.u32 %v3529_v15, %v2508_v14  ;;  %v3545_v19 = vld [vmem:[#allocation5 + $0x164] sm:$0xf0]  ;;  %v2636_v20 = vld [vmem:[#allocation5 + $0x1e0] sm:$0xf]  ;;  %v3511_v24 = vld [vmem:[#allocation5 + $0x54] sm:$0xf0] }
  0x21   :  { %1789 = vmatpush.bf16.msra.mxu3 %v2645_v12  ;;  %v2573_v21 = vor.u32 %v3545_v19, %v2572_v18  ;;  %v3561_v22 = vld [vmem:[#allocation5 + $0x1e4] sm:$0xf0]  ;;  %v2500_v26 = vld [vmem:[#allocation5 + $0xd0] sm:$0xf]  ;;  %v3527_v27 = vld [vmem:[#allocation5 + $0xd4] sm:$0xf0]  ;;  %v2437_v29 = vor.u32 %v3511_v24, %v2436_v23 }
  0x22   :  { %v2637_v25 = vor.u32 %v3561_v22, %v2636_v20  ;;  %v2564_v28 = vld [vmem:[#allocation5 + $0x150] sm:$0xf]  ;;  %1751 = vmatpush.bf16.msra.mxu0 %v2445_v16  ;;  %v3543_v30 = vld [vmem:[#allocation5 + $0x154] sm:$0xf0]  ;;  %v2501_v33 = vor.u32 %v3527_v27, %v2500_v26  ;;  %v2428_v35 = vld [vmem:[#allocation5 + $0x40] sm:$0xf] }
  0x23   :  { %v2628_v31 = vld [vmem:[#allocation5 + $0x1d0] sm:$0xf]  ;;  %v3559_v32 = vld [vmem:[#allocation5 + $0x1d4] sm:$0xf0]  ;;  %1764 = vmatpush.bf16.msra.mxu1 %v2509_v17  ;;  %v2565_v34 = vor.u32 %v3543_v30, %v2564_v28  ;;  %v3509_v36 = vld [vmem:[#allocation5 + $0x44] sm:$0xf0] }
  0x24   :  { %1777 = vmatpush.bf16.msra.mxu2 %v2573_v21  ;;  %v2492_v37 = vld [vmem:[#allocation5 + $0xc0] sm:$0xf]  ;;  %v2629_v38 = vor.u32 %v3559_v32, %v2628_v31  ;;  %v3525_v39 = vld [vmem:[#allocation5 + $0xc4] sm:$0xf0]  ;;  %v2429_v44 = vor.u32 %v3509_v36, %v2428_v35  ;;  %v2420_v47 = vld [vmem:[#allocation5 + $0x30] sm:$0xf] }
  0x25   :  { %1790 = vmatpush.bf16.msra.mxu3 %v2637_v25  ;;  %v2556_v40 = vld [vmem:[#allocation5 + $0x140] sm:$0xf]  ;;  %v3541_v41 = vld [vmem:[#allocation5 + $0x144] sm:$0xf0]  ;;  %v2493_v45 = vor.u32 %v3525_v39, %v2492_v37  ;;  %v3507_v48 = vld [vmem:[#allocation5 + $0x34] sm:$0xf0] }
  0x26   :  { %v2620_v42 = vld [vmem:[#allocation5 + $0x1c0] sm:$0xf]  ;;  %v3557_v43 = vld [vmem:[#allocation5 + $0x1c4] sm:$0xf0]  ;;  %1752 = vmatpush.bf16.msra.mxu0 %v2437_v29  ;;  %v2557_v46 = vor.u32 %v3541_v41, %v2556_v40  ;;  %v2484_v49 = vld [vmem:[#allocation5 + $0xb0] sm:$0xf]  ;;  %v2421_v56 = vor.u32 %v3507_v48, %v2420_v47 }
  0x27   :  { %1765 = vmatpush.bf16.msra.mxu1 %v2501_v33  ;;  %v2621_v50 = vor.u32 %v3557_v43, %v2620_v42  ;;  %v3523_v51 = vld [vmem:[#allocation5 + $0xb4] sm:$0xf0]  ;;  %v2548_v52 = vld [vmem:[#allocation5 + $0x130] sm:$0xf]  ;;  %v2412_v59 = vld [vmem:[#allocation5 + $0x20] sm:$0xf] }
  0x28   :  { %1778 = vmatpush.bf16.msra.mxu2 %v2565_v34  ;;  %v3539_v53 = vld [vmem:[#allocation5 + $0x134] sm:$0xf0]  ;;  %v2612_v54 = vld [vmem:[#allocation5 + $0x1b0] sm:$0xf]  ;;  %v2485_v57 = vor.u32 %v3523_v51, %v2484_v49  ;;  %v3505_v60 = vld [vmem:[#allocation5 + $0x24] sm:$0xf0] }
  0x29   :  { %1791 = vmatpush.bf16.msra.mxu3 %v2629_v38  ;;  %v3555_v55 = vld [vmem:[#allocation5 + $0x1b4] sm:$0xf0]  ;;  %v2549_v58 = vor.u32 %v3539_v53, %v2548_v52  ;;  %v2476_v61 = vld [vmem:[#allocation5 + $0xa0] sm:$0xf]  ;;  %v3521_v63 = vld [vmem:[#allocation5 + $0xa4] sm:$0xf0]  ;;  %v2413_v4 = vor.u32 %v3505_v60, %v2412_v59 }
  0x2a   :  { %1753 = vmatpush.bf16.msra.mxu0 %v2429_v44  ;;  %v2613_v62 = vor.u32 %v3555_v55, %v2612_v54  ;;  %v2540_v0 = vld [vmem:[#allocation5 + $0x120] sm:$0xf]  ;;  %v3537_v1 = vld [vmem:[#allocation5 + $0x124] sm:$0xf0]  ;;  %v2477_v5 = vor.u32 %v3521_v63, %v2476_v61  ;;  %v2404_v7 = vld [vmem:[#allocation5 + $0x10] sm:$0xf] }
  0x2b   :  { %1766 = vmatpush.bf16.msra.mxu1 %v2493_v45  ;;  %v2604_v2 = vld [vmem:[#allocation5 + $0x1a0] sm:$0xf]  ;;  %v3553_v3 = vld [vmem:[#allocation5 + $0x1a4] sm:$0xf0]  ;;  %v2541_v6 = vor.u32 %v3537_v1, %v2540_v0  ;;  %v3503_v8 = vld [vmem:[#allocation5 + $0x14] sm:$0xf0] }
  0x2c   :  { %1779 = vmatpush.bf16.msra.mxu2 %v2557_v46  ;;  %v2468_v9 = vld [vmem:[#allocation5 + $0x90] sm:$0xf]  ;;  %v2605_v10 = vor.u32 %v3553_v3, %v2604_v2  ;;  %v3519_v11 = vld [vmem:[#allocation5 + $0x94] sm:$0xf0]  ;;  %v2405_v16 = vor.u32 %v3503_v8, %v2404_v7  ;;  %v2396_v17 = vld [vmem:[#allocation5] sm:$0xf] }
  0x2d   :  { %1792 = vmatpush.bf16.msra.mxu3 %v2621_v50  ;;  %v2532_v12 = vld [vmem:[#allocation5 + $0x110] sm:$0xf]  ;;  %v3535_v13 = vld [vmem:[#allocation5 + $0x114] sm:$0xf0]  ;;  %v3501_v18 = vld [vmem:[#allocation5 + $0x4] sm:$0xf0]  ;;  %v2469_v19 = vor.u32 %v3519_v11, %v2468_v9 }
  0x2e   :  { %1754 = vmatpush.bf16.msra.mxu0 %v2421_v56  ;;  %v2596_v14 = vld [vmem:[#allocation5 + $0x190] sm:$0xf]  ;;  %v3551_v15 = vld [vmem:[#allocation5 + $0x194] sm:$0xf0]  ;;  %v2533_v20 = vor.u32 %v3535_v13, %v2532_v12  ;;  %v2460_v21 = vld [vmem:[#allocation5 + $0x80] sm:$0xf]  ;;  %v2397_v31 = vor.u32 %v3501_v18, %v2396_v17 }
  0x2f   :  { %1767 = vmatpush.bf16.msra.mxu1 %v2485_v57  ;;  %v3517_v22 = vld [vmem:[#allocation5 + $0x84] sm:$0xf0]  ;;  %v2524_v23 = vld [vmem:[#allocation5 + $0x100] sm:$0xf]  ;;  %v2597_v24 = vor.u32 %v3551_v15, %v2596_v14  ;;  %v2708_v28 = vld [vmem:[#allocation5 + $0x270] sm:$0xf] }
  0x30   :  { %1780 = vmatpush.bf16.msra.mxu2 %v2549_v58  ;;  %v3533_v25 = vld [vmem:[#allocation5 + $0x104] sm:$0xf0]  ;;  %v2588_v26 = vld [vmem:[#allocation5 + $0x180] sm:$0xf]  ;;  %v3579_v29 = vld [vmem:[#allocation5 + $0x274] sm:$0xf0]  ;;  %v2461_v35 = vor.u32 %v3517_v22, %v2460_v21 }
  0x31   :  { %1793 = vmatpush.bf16.msra.mxu3 %v2613_v62  ;;  %v3549_v27 = vld [vmem:[#allocation5 + $0x184] sm:$0xf0]  ;;  %v2772_v30 = vld [vmem:[#allocation5 + $0x2f0] sm:$0xf]  ;;  %v3595_v32 = vld [vmem:[#allocation5 + $0x2f4] sm:$0xf0]  ;;  %v2525_v36 = vor.u32 %v3533_v25, %v2524_v23  ;;  %v2709_v40 = vor.u32 %v3579_v29, %v2708_v28 }
  0x32   :  { %1755 = vmatpush.bf16.msra.mxu0 %v2413_v4  ;;  %v2836_v33 = vld [vmem:[#allocation5 + $0x370] sm:$0xf]  ;;  %v3611_v34 = vld [vmem:[#allocation5 + $0x374] sm:$0xf0]  ;;  %v2589_v39 = vor.u32 %v3549_v27, %v2588_v26  ;;  %v2773_v41 = vor.u32 %v3595_v32, %v2772_v30  ;;  %v2700_v43 = vld [vmem:[#allocation5 + $0x260] sm:$0xf] }
  0x33   :  { %1768 = vmatpush.bf16.msra.mxu1 %v2477_v5  ;;  %v2900_v37 = vld [vmem:[#allocation5 + $0x3f0] sm:$0xf]  ;;  %v3627_v38 = vld [vmem:[#allocation5 + $0x3f4] sm:$0xf0]  ;;  %v2837_v42 = vor.u32 %v3611_v34, %v2836_v33  ;;  %v3577_v44 = vld [vmem:[#allocation5 + $0x264] sm:$0xf0] }
  0x34   :  { %1781 = vmatpush.bf16.msra.mxu2 %v2541_v6  ;;  %v2764_v45 = vld [vmem:[#allocation5 + $0x2e0] sm:$0xf]  ;;  %v2901_v46 = vor.u32 %v3627_v38, %v2900_v37  ;;  %v3593_v47 = vld [vmem:[#allocation5 + $0x2e4] sm:$0xf0]  ;;  %v2701_v52 = vor.u32 %v3577_v44, %v2700_v43  ;;  %v2692_v53 = vld [vmem:[#allocation5 + $0x250] sm:$0xf] }
  0x35   :  { %1794 = vmatpush.bf16.msra.mxu3 %v2605_v10  ;;  %v2828_v48 = vld [vmem:[#allocation5 + $0x360] sm:$0xf]  ;;  %v3609_v49 = vld [vmem:[#allocation5 + $0x364] sm:$0xf0]  ;;  %v3575_v54 = vld [vmem:[#allocation5 + $0x254] sm:$0xf0]  ;;  %v2765_v55 = vor.u32 %v3593_v47, %v2764_v45 }
  0x36   :  { %1756 = vmatpush.bf16.msra.mxu0 %v2405_v16  ;;  %v2892_v50 = vld [vmem:[#allocation5 + $0x3e0] sm:$0xf]  ;;  %v3625_v51 = vld [vmem:[#allocation5 + $0x3e4] sm:$0xf0]  ;;  %v2829_v56 = vor.u32 %v3609_v49, %v2828_v48  ;;  %v2756_v57 = vld [vmem:[#allocation5 + $0x2d0] sm:$0xf]  ;;  %v2693_v6 = vor.u32 %v3575_v54, %v2692_v53 }
  0x37   :  { %1769 = vmatpush.bf16.msra.mxu1 %v2469_v19  ;;  %v3591_v58 = vld [vmem:[#allocation5 + $0x2d4] sm:$0xf0]  ;;  %v113_v59 = vld [vmem:[#allocation2 + $0x8] sm:$0xff]  ;;  %v2893_v60 = vor.u32 %v3625_v51, %v2892_v50  ;;  %v2820_v61 = vld [vmem:[#allocation5 + $0x350] sm:$0xf]  ;;  %vm1746_vm0 = vcmask 261120  }
  0x38   :  { %1782 = vmatpush.bf16.msra.mxu2 %v2533_v20  ;;  %v3607_v62 = vld [vmem:[#allocation5 + $0x354] sm:$0xf0]  ;;  %v398_v63 = vunpack.c.l.b16 %v113_v59  ;;  %v112_v0 = vld [vmem:[#allocation2] sm:$0xff]  ;;  %v399_v1 = vunpack.c.h.b16 %v113_v59  ;;  %v2884_v2 = vld [vmem:[#allocation5 + $0x3d0] sm:$0xf]  ;;  %v2757_v9 = vor.u32 %v3591_v58, %v2756_v57  ;;  %s2381_s10 = sshll.u32 %s4192_s7, 4  ;;  %s2382_s10 = int_to_ptr.hbm [resolvable:$true] %s2381_s10 }
  0x39   :  { %1795 = vmatpush.bf16.msra.mxu3 %v2597_v24  ;;  %v3623_v3 = vld [vmem:[#allocation5 + $0x3d4] sm:$0xf0]  ;;  %v396_v4 = vunpack.c.l.b16 %v112_v0  ;;  %v397_v5 = vunpack.c.h.b16 %v112_v0  ;;  %v2821_v10 = vor.u32 %v3607_v62, %v2820_v61  ;;  %v2684_v11 = vld [vmem:[#allocation5 + $0x240] sm:$0xf]  ;;  %v3573_v12 = vld [vmem:[#allocation5 + $0x244] sm:$0xf0] }
  0x3a   :  { %1757 = vmatpush.bf16.msra.mxu0 %v2397_v31  ;;  %v4033_v7 = vpack.c.b16 %v398_v63, %v398_v63  ;;  %v4035_v8 = vpack.c.b16 %v399_v1, %v399_v1  ;;  %v2748_v13 = vld [vmem:[#allocation5 + $0x2c0] sm:$0xf]  ;;  %v2885_v15 = vor.u32 %v3623_v3, %v2884_v2  ;;  %v3589_v16 = vld [vmem:[#allocation5 + $0x2c4] sm:$0xf0]  ;;  %v2685_v22 = vor.u32 %v3573_v12, %v2684_v11  ;;  %v2676_v25 = vld [vmem:[#allocation5 + $0x230] sm:$0xf] }
  0x3b   :  { %1770 = vmatpush.bf16.msra.mxu1 %v2461_v35  ;;  %v4037_v14 = vpack.c.b16 %v396_v4, %v396_v4  ;;  %v2812_v17 = vld [vmem:[#allocation5 + $0x340] sm:$0xf]  ;;  %v3605_v18 = vld [vmem:[#allocation5 + $0x344] sm:$0xf0]  ;;  %v4040_v19 = vpack.c.b16 %v397_v5, %v397_v5  ;;  %v2749_v23 = vor.u32 %v3589_v16, %v2748_v13  ;;  %v3571_v26 = vld [vmem:[#allocation5 + $0x234] sm:$0xf0] }
  0x3c   :  { %1783 = vmatpush.bf16.msra.mxu2 %v2525_v36  ;;  %v2876_v20 = vld [vmem:[#allocation5 + $0x3c0] sm:$0xf]  ;;  %v3621_v21 = vld [vmem:[#allocation5 + $0x3c4] sm:$0xf0]  ;;  %v2813_v24 = vor.u32 %v3605_v18, %v2812_v17  ;;  %v2740_v27 = vld [vmem:[#allocation5 + $0x2b0] sm:$0xf]  ;;  %v2677_v34 = vor.u32 %v3571_v26, %v2676_v25 }
  0x3d   :  { %1796 = vmatpush.bf16.msra.mxu3 %v2589_v39  ;;  %1758 = vmatmul.bf16.vlgmr.msra.gmra.mxu0 %v4037_v14  ;;  %v2877_v28 = vor.u32 %v3621_v21, %v2876_v20  ;;  %v3587_v29 = vld [vmem:[#allocation5 + $0x2b4] sm:$0xf0]  ;;  %v2804_v30 = vld [vmem:[#allocation5 + $0x330] sm:$0xf]  ;;  %v2668_v37 = vld [vmem:[#allocation5 + $0x220] sm:$0xf] }
  0x3e   :  { %1802 = vmatpush.bf16.msrb.mxu0 %v2709_v40  ;;  %1771 = vmatmul.bf16.vlgmr.msra.gmra.mxu1 %v4040_v19  ;;  %v3603_v31 = vld [vmem:[#allocation5 + $0x334] sm:$0xf0]  ;;  %v2868_v32 = vld [vmem:[#allocation5 + $0x3b0] sm:$0xf]  ;;  %v2741_v35 = vor.u32 %v3587_v29, %v2740_v27  ;;  %v3569_v38 = vld [vmem:[#allocation5 + $0x224] sm:$0xf0] }
  0x3f   :  { %1815 = vmatpush.bf16.msrb.mxu1 %v2773_v41  ;;  %1784 = vmatmul.bf16.vlgmr.msra.gmra.mxu2 %v4033_v7  ;;  %v3619_v33 = vld [vmem:[#allocation5 + $0x3b4] sm:$0xf0]  ;;  %v2805_v36 = vor.u32 %v3603_v31, %v2804_v30  ;;  %v2732_v39 = vld [vmem:[#allocation5 + $0x2a0] sm:$0xf]  ;;  %v3585_v41 = vld [vmem:[#allocation5 + $0x2a4] sm:$0xf0] }
  0x40   :  { %1828 = vmatpush.bf16.msrb.mxu2 %v2837_v42  ;;  %1797 = vmatmul.bf16.vlgmr.msra.gmra.mxu3 %v4035_v8  ;;  %v2869_v40 = vor.u32 %v3619_v33, %v2868_v32  ;;  %v2796_v42 = vld [vmem:[#allocation5 + $0x320] sm:$0xf]  ;;  %v3601_v43 = vld [vmem:[#allocation5 + $0x324] sm:$0xf0]  ;;  %v2733_v47 = vor.u32 %v3585_v41, %v2732_v39  ;;  %v2660_v49 = vld [vmem:[#allocation5 + $0x210] sm:$0xf] }
  0x41   :  { %1841 = vmatpush.bf16.msrb.mxu3 %v2901_v46  ;;  %v2860_v44 = vld [vmem:[#allocation5 + $0x3a0] sm:$0xf]  ;;  %v3617_v45 = vld [vmem:[#allocation5 + $0x3a4] sm:$0xf0]  ;;  %v2669_v46 = vor.u32 %v3569_v38, %v2668_v37  ;;  %v2797_v48 = vor.u32 %v3601_v43, %v2796_v42  ;;  %v3567_v50 = vld [vmem:[#allocation5 + $0x214] sm:$0xf0] }
  0x42   :  { %1803 = vmatpush.bf16.msrb.mxu0 %v2701_v52  ;;  %v2724_v51 = vld [vmem:[#allocation5 + $0x290] sm:$0xf]  ;;  %v2861_v52 = vor.u32 %v3617_v45, %v2860_v44  ;;  %v3583_v53 = vld [vmem:[#allocation5 + $0x294] sm:$0xf0]  ;;  %v2652_v58 = vld [vmem:[#allocation5 + $0x200] sm:$0xf]  ;;  %v2661_v59 = vor.u32 %v3567_v50, %v2660_v49 }
  0x43   :  { %1816 = vmatpush.bf16.msrb.mxu1 %v2765_v55  ;;  %v2788_v54 = vld [vmem:[#allocation5 + $0x310] sm:$0xf]  ;;  %v3599_v55 = vld [vmem:[#allocation5 + $0x314] sm:$0xf0]  ;;  %v2716_v61 = vld [vmem:[#allocation5 + $0x280] sm:$0xf]  ;;  %v2725_v63 = vor.u32 %v3583_v53, %v2724_v51 }
  0x44   :  { %1829 = vmatpush.bf16.msrb.mxu2 %v2829_v56  ;;  %v2852_v56 = vld [vmem:[#allocation5 + $0x390] sm:$0xf]  ;;  %v3615_v57 = vld [vmem:[#allocation5 + $0x394] sm:$0xf0]  ;;  %v3581_v62 = vld [vmem:[#allocation5 + $0x284] sm:$0xf0]  ;;  %v2789_v0 = vor.u32 %v3599_v55, %v2788_v54 }
  0x45   :  { %1842 = vmatpush.bf16.msrb.mxu3 %v2893_v60  ;;  %v3565_v60 = vld [vmem:[#allocation5 + $0x204] sm:$0xf0]  ;;  %v2780_v1 = vld [vmem:[#allocation5 + $0x300] sm:$0xf]  ;;  %v115_v3 = vld [vmem:[#allocation2 + $0x18] sm:$0xff]  ;;  %v2853_v4 = vor.u32 %v3615_v57, %v2852_v56  ;;  %v2717_v20 = vor.u32 %v3581_v62, %v2716_v61  ;;  %vm2372_vm4 = vcmask 519168  }
  0x46   :  { %1804 = vmatpush.bf16.msrb.mxu0 %v2693_v6  ;;  %v3597_v2 = vld [vmem:[#allocation5 + $0x304] sm:$0xf0]  ;;  %v2844_v5 = vld [vmem:[#allocation5 + $0x380] sm:$0xf]  ;;  %v3643_v11 = vld [vmem:[#allocation5 + $0x474] sm:$0xf0]  ;;  %v2653_v13 = vor.u32 %v3565_v60, %v2652_v58  ;;  %v402_v18 = vunpack.c.l.b16 %v115_v3  ;;  %v403_v25 = vunpack.c.h.b16 %v115_v3 }
  0x47   :  { %1817 = vmatpush.bf16.msrb.mxu1 %v2757_v9  ;;  %v3613_v6 = vld [vmem:[#allocation5 + $0x384] sm:$0xf0]  ;;  %v114_v9 = vld [vmem:[#allocation2 + $0x10] sm:$0xff]  ;;  %v3675_v17 = vld [vmem:[#allocation5 + $0x574] sm:$0xf0]  ;;  %v2781_v21 = vor.u32 %v3597_v2, %v2780_v1 }
  0x48   :  { %1830 = vmatpush.bf16.msrb.mxu2 %v2821_v10  ;;  %v2964_v10 = vld [vmem:[#allocation5 + $0x470] sm:$0xf]  ;;  %v2845_v26 = vor.u32 %v3613_v6, %v2844_v5  ;;  %v2956_v31 = vld [vmem:[#allocation5 + $0x460] sm:$0xf]  ;;  %v3641_v32 = vld [vmem:[#allocation5 + $0x464] sm:$0xf0]  ;;  %v4049_v42 = vpack.c.b16 %v403_v25, %v403_v25 }
  0x49   :  { %1843 = vmatpush.bf16.msrb.mxu3 %v2885_v15  ;;  %v3028_v12 = vld [vmem:[#allocation5 + $0x4f0] sm:$0xf]  ;;  %v3659_v15 = vld [vmem:[#allocation5 + $0x4f4] sm:$0xf0]  ;;  %v2965_v27 = vor.u32 %v3643_v11, %v2964_v10  ;;  %v3020_v33 = vld [vmem:[#allocation5 + $0x4e0] sm:$0xf]  ;;  %v2957_v43 = vor.u32 %v3641_v32, %v2956_v31 }
  0x4a   :  { %1805 = vmatpush.bf16.msrb.mxu0 %v2685_v22  ;;  %v3092_v16 = vld [vmem:[#allocation5 + $0x570] sm:$0xf]  ;;  %v3029_v29 = vor.u32 %v3659_v15, %v3028_v12  ;;  %v3084_v37 = vld [vmem:[#allocation5 + $0x560] sm:$0xf]  ;;  %v3673_v38 = vld [vmem:[#allocation5 + $0x564] sm:$0xf0] }
  0x4b   :  { %1818 = vmatpush.bf16.msrb.mxu1 %v2749_v23  ;;  %v3156_v22 = vld [vmem:[#allocation5 + $0x5f0] sm:$0xf]  ;;  %v3691_v23 = vld [vmem:[#allocation5 + $0x5f4] sm:$0xf0]  ;;  %v3093_v30 = vor.u32 %v3675_v17, %v3092_v16  ;;  %v3148_v39 = vld [vmem:[#allocation5 + $0x5e0] sm:$0xf] }
  0x4c   :  { %1831 = vmatpush.bf16.msrb.mxu2 %v2813_v24  ;;  %v400_v24 = vunpack.c.l.b16 %v114_v9  ;;  %v3012_v49 = vld [vmem:[#allocation5 + $0x4d0] sm:$0xf]  ;;  %v3655_v51 = vld [vmem:[#allocation5 + $0x4d4] sm:$0xf0]  ;;  %v3637_v60 = vld [vmem:[#allocation5 + $0x444] sm:$0xf0] }
  0x4d   :  { %1844 = vmatpush.bf16.msrb.mxu3 %v2877_v28  ;;  %v401_v28 = vunpack.c.h.b16 %v114_v9  ;;  %v3671_v53 = vld [vmem:[#allocation5 + $0x554] sm:$0xf0]  ;;  %v3140_v54 = vld [vmem:[#allocation5 + $0x5d0] sm:$0xf]  ;;  %v3013_v57 = vor.u32 %v3655_v51, %v3012_v49  ;;  %v3004_v61 = vld [vmem:[#allocation5 + $0x4c0] sm:$0xf] }
  0x4e   :  { %1806 = vmatpush.bf16.msrb.mxu0 %v2677_v34  ;;  %v3157_v34 = vor.u32 %v3691_v23, %v3156_v22  ;;  %v4047_v41 = vpack.c.b16 %v400_v24, %v400_v24  ;;  %v3687_v55 = vld [vmem:[#allocation5 + $0x5d4] sm:$0xf0]  ;;  %v3669_v1 = vld [vmem:[#allocation5 + $0x544] sm:$0xf0]  ;;  %v3132_v2 = vld [vmem:[#allocation5 + $0x5c0] sm:$0xf] }
  0x4f   :  { %1819 = vmatpush.bf16.msrb.mxu1 %v2741_v35  ;;  %v4045_v35 = vpack.c.b16 %v402_v18, %v402_v18  ;;  %v4051_v44 = vpack.c.b16 %v401_v28, %v401_v28  ;;  %v3141_v62 = vor.u32 %v3687_v55, %v3140_v54  ;;  %v3685_v3 = vld [vmem:[#allocation5 + $0x5c4] sm:$0xf0]  ;;  %v2932_v9 = vld [vmem:[#allocation5 + $0x430] sm:$0xf]  ;;  %v3635_v10 = vld [vmem:[#allocation5 + $0x434] sm:$0xf0] }
  0x50   :  { %1832 = vmatpush.bf16.msrb.mxu2 %v2805_v36  ;;  %v3657_v36 = vld [vmem:[#allocation5 + $0x4e4] sm:$0xf0]  ;;  %v2996_v11 = vld [vmem:[#allocation5 + $0x4b0] sm:$0xf]  ;;  %v3133_v12 = vor.u32 %v3685_v3, %v3132_v2  ;;  %v3667_v16 = vld [vmem:[#allocation5 + $0x534] sm:$0xf0] }
  0x51   :  { %1845 = vmatpush.bf16.msrb.mxu3 %v2869_v40  ;;  %v3689_v40 = vld [vmem:[#allocation5 + $0x5e4] sm:$0xf0]  ;;  %v3021_v45 = vor.u32 %v3657_v36, %v3020_v33  ;;  %v3060_v15 = vld [vmem:[#allocation5 + $0x530] sm:$0xf]  ;;  %v3683_v18 = vld [vmem:[#allocation5 + $0x5b4] sm:$0xf0] }
  0x52   :  { %1807 = vmatpush.bf16.msrb.mxu0 %v2669_v46  ;;  %v3085_v46 = vor.u32 %v3673_v38, %v3084_v37  ;;  %v3149_v50 = vor.u32 %v3689_v40, %v3148_v39  ;;  %v3124_v17 = vld [vmem:[#allocation5 + $0x5b0] sm:$0xf]  ;;  %v3061_v22 = vor.u32 %v3667_v16, %v3060_v15  ;;  %v2924_v23 = vld [vmem:[#allocation5 + $0x420] sm:$0xf]  ;;  %v3633_v24 = vld [vmem:[#allocation5 + $0x424] sm:$0xf0] }
  0x53   :  { %1820 = vmatpush.bf16.msrb.mxu1 %v2733_v47  ;;  %v2948_v47 = vld [vmem:[#allocation5 + $0x450] sm:$0xf]  ;;  %v2988_v25 = vld [vmem:[#allocation5 + $0x4a0] sm:$0xf]  ;;  %v3681_v31 = vld [vmem:[#allocation5 + $0x5a4] sm:$0xf0]  ;;  %v2925_v32 = vor.u32 %v3633_v24, %v2924_v23 }
  0x54   :  { %1833 = vmatpush.bf16.msrb.mxu2 %v2797_v48  ;;  %v3639_v48 = vld [vmem:[#allocation5 + $0x454] sm:$0xf0]  ;;  %v3052_v28 = vld [vmem:[#allocation5 + $0x520] sm:$0xf]  ;;  %v2916_v33 = vld [vmem:[#allocation5 + $0x410] sm:$0xf] }
  0x55   :  { %1846 = vmatpush.bf16.msrb.mxu3 %v2861_v52  ;;  %v3076_v52 = vld [vmem:[#allocation5 + $0x550] sm:$0xf]  ;;  %v2949_v56 = vor.u32 %v3639_v48, %v2948_v47  ;;  %v3647_v39 = vld [vmem:[#allocation5 + $0x494] sm:$0xf0]  ;;  %v2908_v48 = vld [vmem:[#allocation5 + $0x400] sm:$0xf] }
  0x56   :  { %1808 = vmatpush.bf16.msrb.mxu0 %v2661_v59  ;;  %v3077_v58 = vor.u32 %v3671_v53, %v3076_v52  ;;  %v2940_v59 = vld [vmem:[#allocation5 + $0x440] sm:$0xf]  ;;  %v2980_v38 = vld [vmem:[#allocation5 + $0x490] sm:$0xf]  ;;  %v3679_v47 = vld [vmem:[#allocation5 + $0x594] sm:$0xf0] }
  0x57   :  { %1821 = vmatpush.bf16.msrb.mxu1 %v2725_v63  ;;  %v3653_v63 = vld [vmem:[#allocation5 + $0x4c4] sm:$0xf0]  ;;  %v3044_v40 = vld [vmem:[#allocation5 + $0x510] sm:$0xf]  ;;  %v2972_v51 = vld [vmem:[#allocation5 + $0x480] sm:$0xf]  ;;  %v2981_v53 = vor.u32 %v3647_v39, %v2980_v38 }
  0x58   :  { %1834 = vmatpush.bf16.msrb.mxu2 %v2789_v0  ;;  %v3068_v0 = vld [vmem:[#allocation5 + $0x540] sm:$0xf]  ;;  %v3005_v5 = vor.u32 %v3653_v63, %v3004_v61  ;;  %v3645_v52 = vld [vmem:[#allocation5 + $0x484] sm:$0xf0]  ;;  %v3707_v63 = vld [vmem:[#allocation5 + $0x674] sm:$0xf0] }
  0x59   :  { %1847 = vmatpush.bf16.msrb.mxu3 %v2853_v4  ;;  %v2941_v4 = vor.u32 %v3637_v60, %v2940_v59  ;;  %v3069_v6 = vor.u32 %v3669_v1, %v3068_v0  ;;  %v3036_v55 = vld [vmem:[#allocation5 + $0x500] sm:$0xf]  ;;  %v3677_v60 = vld [vmem:[#allocation5 + $0x584] sm:$0xf0]  ;;  %v3284_v0 = vld [vmem:[#allocation5 + $0x6f0] sm:$0xf] }
  0x5a   :  { %1809 = vmatpush.bf16.msrb.mxu0 %v2653_v13  ;;  %v3651_v13 = vld [vmem:[#allocation5 + $0x4b4] sm:$0xf0]  ;;  %v3100_v59 = vld [vmem:[#allocation5 + $0x580] sm:$0xf]  ;;  %v117_v61 = vld [vmem:[#allocation2 + $0x28] sm:$0xff] }
  0x5b   :  { %1822 = vmatpush.bf16.msrb.mxu1 %v2717_v20  ;;  %v2933_v20 = vor.u32 %v3635_v10, %v2932_v9  ;;  %v3723_v2 = vld [vmem:[#allocation5 + $0x6f4] sm:$0xf0]  ;;  %v3348_v3 = vld [vmem:[#allocation5 + $0x770] sm:$0xf]  ;;  %v3101_v15 = vor.u32 %v3677_v60, %v3100_v59  ;;  %v3276_v23 = vld [vmem:[#allocation5 + $0x6e0] sm:$0xf] }
  0x5c   :  { %1835 = vmatpush.bf16.msrb.mxu2 %v2781_v21  ;;  %v2997_v21 = vor.u32 %v3651_v13, %v2996_v11  ;;  %v3412_v10 = vld [vmem:[#allocation5 + $0x7f0] sm:$0xf]  ;;  %v3755_v11 = vld [vmem:[#allocation5 + $0x7f4] sm:$0xf0]  ;;  %v3733_v59 = vld [vmem:[#allocation5 + $0x744] sm:$0xf0] }
  0x5d   :  { %1848 = vmatpush.bf16.msrb.mxu3 %v2845_v26  ;;  %1810 = vmatmul.bf16.vlgmr.msrb.gmra.mxu0 %v4047_v41  ;;  %v3125_v26 = vor.u32 %v3683_v18, %v3124_v17  ;;  %v407_v17 = vunpack.c.h.b16 %v117_v61  ;;  %v3285_v18 = vor.u32 %v3723_v2, %v3284_v0  ;;  %v3413_v24 = vor.u32 %v3755_v11, %v3412_v10  ;;  %v3204_v38 = vld [vmem:[#allocation5 + $0x650] sm:$0xf]  ;;  %v3703_v39 = vld [vmem:[#allocation5 + $0x654] sm:$0xf0]  ;;  %v3388_v60 = vld [vmem:[#allocation5 + $0x7c0] sm:$0xf] }
  0x5e   :  { %1854 = vmatpush.bf16.msra.mxu0 %v2965_v27  ;;  %1823 = vmatmul.bf16.vlgmr.msrb.gmra.mxu1 %v4051_v44  ;;  %v3649_v27 = vld [vmem:[#allocation5 + $0x4a4] sm:$0xf0]  ;;  %v3699_v2 = vld [vmem:[#allocation5 + $0x634] sm:$0xf0]  ;;  %v3380_v10 = vld [vmem:[#allocation5 + $0x7b0] sm:$0xf] }
  0x5f   :  { %1867 = vmatpush.bf16.msra.mxu1 %v3029_v29  ;;  %1836 = vmatmul.bf16.vlgmr.msrb.gmra.mxu2 %v4045_v35  ;;  %v3665_v29 = vld [vmem:[#allocation5 + $0x524] sm:$0xf0]  ;;  %v2989_v36 = vor.u32 %v3649_v27, %v2988_v25  ;;  %v3340_v27 = vld [vmem:[#allocation5 + $0x760] sm:$0xf]  ;;  %v3747_v11 = vld [vmem:[#allocation5 + $0x7b4] sm:$0xf0] }
  0x60   :  { %1880 = vmatpush.bf16.msra.mxu2 %v3093_v30  ;;  %1849 = vmatmul.bf16.vlgmr.msrb.gmra.mxu3 %v4049_v42  ;;  %v3116_v30 = vld [vmem:[#allocation5 + $0x5a0] sm:$0xf]  ;;  %v3053_v37 = vor.u32 %v3665_v29, %v3052_v28  ;;  %v3737_v28 = vld [vmem:[#allocation5 + $0x764] sm:$0xf0] }
  0x61   :  { %1893 = vmatpush.bf16.msra.mxu3 %v3157_v34  ;;  %v3631_v34 = vld [vmem:[#allocation5 + $0x414] sm:$0xf0] }
  0x62   :  { %1855 = vmatpush.bf16.msra.mxu0 %v2957_v43  ;;  %v3117_v43 = vor.u32 %v3681_v31, %v3116_v30  ;;  %v2917_v49 = vor.u32 %v3631_v34, %v2916_v33  ;;  %v3404_v31 = vld [vmem:[#allocation5 + $0x7e0] sm:$0xf]  ;;  %v4063_v33 = vpack.c.b16 %v407_v17, %v407_v17  ;;  %v3697_v17 = vld [vmem:[#allocation5 + $0x624] sm:$0xf0] }
  0x63   :  { %1868 = vmatpush.bf16.msra.mxu1 %v3021_v45  ;;  %v3663_v45 = vld [vmem:[#allocation5 + $0x514] sm:$0xf0] }
  0x64   :  { %1881 = vmatpush.bf16.msra.mxu2 %v3085_v46  ;;  %v3108_v46 = vld [vmem:[#allocation5 + $0x590] sm:$0xf]  ;;  %v3045_v54 = vor.u32 %v3663_v45, %v3044_v40  ;;  %v3719_v45 = vld [vmem:[#allocation5 + $0x6d4] sm:$0xf0] }
  0x65   :  { %1894 = vmatpush.bf16.msra.mxu3 %v3149_v50  ;;  %v3629_v50 = vld [vmem:[#allocation5 + $0x404] sm:$0xf0]  ;;  %v3268_v40 = vld [vmem:[#allocation5 + $0x6d0] sm:$0xf] }
  0x66   :  { %1856 = vmatpush.bf16.msra.mxu0 %v2949_v56  ;;  %v3661_v56 = vld [vmem:[#allocation5 + $0x504] sm:$0xf0]  ;;  %v2909_v1 = vor.u32 %v3629_v50, %v2908_v48  ;;  %v3396_v48 = vld [vmem:[#allocation5 + $0x7d0] sm:$0xf]  ;;  %v3205_v50 = vor.u32 %v3703_v39, %v3204_v38  ;;  %v3711_v38 = vld [vmem:[#allocation5 + $0x694] sm:$0xf0] }
  0x67   :  { %1869 = vmatpush.bf16.msra.mxu1 %v3013_v57  ;;  %v116_v57 = vld [vmem:[#allocation2 + $0x20] sm:$0xff]  ;;  %v3037_v9 = vor.u32 %v3661_v56, %v3036_v55  ;;  %v3300_v39 = vld [vmem:[#allocation5 + $0x710] sm:$0xf] }
  0x68   :  { %1882 = vmatpush.bf16.msra.mxu2 %v3077_v58  ;;  %v3109_v58 = vor.u32 %v3679_v47, %v3108_v46  ;;  %v405_v13 = vunpack.c.h.b16 %v116_v57  ;;  %v3332_v46 = vld [vmem:[#allocation5 + $0x750] sm:$0xf]  ;;  %v3735_v47 = vld [vmem:[#allocation5 + $0x754] sm:$0xf0]  ;;  %v3260_v55 = vld [vmem:[#allocation5 + $0x6c0] sm:$0xf] }
  0x69   :  { %1895 = vmatpush.bf16.msra.mxu3 %v3141_v62  ;;  %v3220_v62 = vld [vmem:[#allocation5 + $0x670] sm:$0xf] }
  0x6a   :  { %1857 = vmatpush.bf16.msra.mxu0 %v2941_v4  ;;  %v3739_v4 = vld [vmem:[#allocation5 + $0x774] sm:$0xf0]  ;;  %v3221_v16 = vor.u32 %v3707_v63, %v3220_v62  ;;  %v4061_v30 = vpack.c.b16 %v405_v13, %v405_v13 }
  0x6b   :  { %1870 = vmatpush.bf16.msra.mxu1 %v3005_v5  ;;  %v404_v5 = vunpack.c.l.b16 %v116_v57  ;;  %v3717_v57 = vld [vmem:[#allocation5 + $0x6c4] sm:$0xf0] }
  0x6c   :  { %1883 = vmatpush.bf16.msra.mxu2 %v3069_v6  ;;  %v2973_v6 = vor.u32 %v3645_v52, %v2972_v51  ;;  %v3269_v51 = vor.u32 %v3719_v45, %v3268_v40  ;;  %v3333_v52 = vor.u32 %v3735_v47, %v3332_v46  ;;  %v3261_v63 = vor.u32 %v3717_v57, %v3260_v55  ;;  %v3727_v40 = vld [vmem:[#allocation5 + $0x714] sm:$0xf0]  ;;  %v3164_v46 = vld [vmem:[#allocation5 + $0x600] sm:$0xf] }
  0x6d   :  { %1896 = vmatpush.bf16.msra.mxu3 %v3133_v12  ;;  %v406_v12 = vunpack.c.l.b16 %v117_v61  ;;  %v4057_v25 = vpack.c.b16 %v404_v5, %v404_v5  ;;  %v3749_v61 = vld [vmem:[#allocation5 + $0x7c4] sm:$0xf0]  ;;  %v3715_v5 = vld [vmem:[#allocation5 + $0x6b4] sm:$0xf0]  ;;  %v3356_v57 = vld [vmem:[#allocation5 + $0x780] sm:$0xf] }
  0x6e   :  { %1858 = vmatpush.bf16.msra.mxu0 %v2933_v20  ;;  %v3349_v20 = vor.u32 %v3739_v4, %v3348_v3  ;;  %v3252_v3 = vld [vmem:[#allocation5 + $0x6b0] sm:$0xf]  ;;  %v3389_v4 = vor.u32 %v3749_v61, %v3388_v60  ;;  %v3743_v45 = vld [vmem:[#allocation5 + $0x794] sm:$0xf0]  ;;  %v3514_v60 = vld [vmem:[#allocation5 + $0x74] sm:$0xf] }
  0x6f   :  { %1871 = vmatpush.bf16.msra.mxu1 %v2997_v21  ;;  %v3212_v21 = vld [vmem:[#allocation5 + $0x660] sm:$0xf]  ;;  %v4059_v29 = vpack.c.b16 %v406_v12, %v406_v12  ;;  %v3253_v13 = vor.u32 %v3715_v5, %v3252_v3  ;;  %v119_v55 = vld [vmem:[#allocation2 + $0x38] sm:$0xff]  ;;  %v2454_v61 = vld [vmem:[#allocation5 + $0x78] sm:$0xf0] }
  0x70   :  { %1884 = vmatpush.bf16.msra.mxu2 %v3061_v22  ;;  %v3705_v22 = vld [vmem:[#allocation5 + $0x664] sm:$0xf0]  ;;  %v410_v3 = vunpack.c.l.b16 %v119_v55 }
  0x71   :  { %1897 = vmatpush.bf16.msra.mxu3 %v3125_v26  ;;  %v3721_v26 = vld [vmem:[#allocation5 + $0x6e4] sm:$0xf0]  ;;  %v3213_v34 = vor.u32 %v3705_v22, %v3212_v21  ;;  %v3308_v22 = vld [vmem:[#allocation5 + $0x720] sm:$0xf] }
  0x72   :  { %1859 = vmatpush.bf16.msra.mxu0 %v2925_v32  ;;  %v3753_v32 = vld [vmem:[#allocation5 + $0x7e4] sm:$0xf0] }
  0x73   :  { %1872 = vmatpush.bf16.msra.mxu1 %v2989_v36  ;;  %v3277_v36 = vor.u32 %v3721_v26, %v3276_v23  ;;  %v3713_v21 = vld [vmem:[#allocation5 + $0x6a4] sm:$0xf0] }
  0x74   :  { %1885 = vmatpush.bf16.msra.mxu2 %v3053_v37  ;;  %v3341_v37 = vor.u32 %v3737_v28, %v3340_v27  ;;  %v3729_v23 = vld [vmem:[#allocation5 + $0x724] sm:$0xf0] }
  0x75   :  { %1898 = vmatpush.bf16.msra.mxu3 %v3117_v43  ;;  %v3405_v43 = vor.u32 %v3753_v32, %v3404_v31  ;;  %v3745_v26 = vld [vmem:[#allocation5 + $0x7a4] sm:$0xf0]  ;;  %v3309_v31 = vor.u32 %v3729_v23, %v3308_v22  ;;  %v3172_v32 = vld [vmem:[#allocation5 + $0x610] sm:$0xf]  ;;  %v4069_v23 = vpack.c.b16 %v410_v3, %v410_v3  ;;  %v2630_v3 = vld [vmem:[#allocation5 + $0x1d8] sm:$0xf0] }
  0x76   :  { %1860 = vmatpush.bf16.msra.mxu0 %v2917_v49  ;;  %v3751_v49 = vld [vmem:[#allocation5 + $0x7d4] sm:$0xf0] }
  0x77   :  { %1873 = vmatpush.bf16.msra.mxu1 %v2981_v53  ;;  %v3196_v53 = vld [vmem:[#allocation5 + $0x640] sm:$0xf]  ;;  %v3397_v56 = vor.u32 %v3751_v49, %v3396_v48  ;;  %v3693_v48 = vld [vmem:[#allocation5 + $0x604] sm:$0xf0] }
  0x78   :  { %1886 = vmatpush.bf16.msra.mxu2 %v3045_v54  ;;  %v3701_v54 = vld [vmem:[#allocation5 + $0x644] sm:$0xf0]  ;;  %v3228_v49 = vld [vmem:[#allocation5 + $0x680] sm:$0xf] }
  0x79   :  { %1899 = vmatpush.bf16.msra.mxu3 %v3109_v58  ;;  %v3324_v58 = vld [vmem:[#allocation5 + $0x740] sm:$0xf]  ;;  %v3197_v62 = vor.u32 %v3701_v54, %v3196_v53  ;;  %v3725_v54 = vld [vmem:[#allocation5 + $0x704] sm:$0xf0] }
  0x7a   :  { %1861 = vmatpush.bf16.msra.mxu0 %v2909_v1  ;;  %v3325_v0 = vor.u32 %v3733_v59, %v3324_v58  ;;  %v3188_v1 = vld [vmem:[#allocation5 + $0x630] sm:$0xf]  ;;  %v3292_v53 = vld [vmem:[#allocation5 + $0x700] sm:$0xf]  ;;  %v3741_v58 = vld [vmem:[#allocation5 + $0x784] sm:$0xf0] }
  0x7b   :  { %1874 = vmatpush.bf16.msra.mxu1 %v2973_v6  ;;  %v3316_v6 = vld [vmem:[#allocation5 + $0x730] sm:$0xf]  ;;  %v3189_v12 = vor.u32 %v3699_v2, %v3188_v1  ;;  %v3546_v1 = vld [vmem:[#allocation5 + $0x174] sm:$0xf]  ;;  %v2582_v2 = vld [vmem:[#allocation5 + $0x178] sm:$0xf0]  ;;  %v3293_v5 = vor.u32 %v3725_v54, %v3292_v53 }
  0x7c   :  { %1887 = vmatpush.bf16.msra.mxu2 %v3037_v9  ;;  %v3731_v9 = vld [vmem:[#allocation5 + $0x734] sm:$0xf0]  ;;  %v118_v59 = vld [vmem:[#allocation2 + $0x30] sm:$0xff]  ;;  %v3560_v54 = vld [vmem:[#allocation5 + $0x1e4] sm:$0xf] }
  0x7d   :  { %1900 = vmatpush.bf16.msra.mxu3 %v3101_v15  ;;  %1862 = vmatmul.bf16.vlgmr.msra.gmra.mxu0 %v4057_v25  ;;  %v3317_v15 = vor.u32 %v3731_v9, %v3316_v6  ;;  %v3428_v6 = vld [vmem:[#allocation5 + $0x810] sm:$0xf]  ;;  %v3759_v9 = vld [vmem:[#allocation5 + $0x814] sm:$0xf0] }
  0x7e   :  { %1906 = vmatpush.bf16.msrb.mxu0 %v3221_v16  ;;  %1875 = vmatmul.bf16.vlgmr.msra.gmra.mxu1 %v4061_v30  ;;  %v3180_v16 = vld [vmem:[#allocation5 + $0x620] sm:$0xf]  ;;  %v3429_v22 = vor.u32 %v3759_v9, %v3428_v6  ;;  %v3506_v9 = vld [vmem:[#allocation5 + $0x34] sm:$0xf] }
  0x7f   :  { %1919 = vmatpush.bf16.msrb.mxu1 %v3285_v18  ;;  %1888 = vmatmul.bf16.vlgmr.msra.gmra.mxu2 %v4059_v29  ;;  %v3244_v18 = vld [vmem:[#allocation5 + $0x6a0] sm:$0xf]  ;;  %v3181_v27 = vor.u32 %v3697_v17, %v3180_v16  ;;  %v2585_v17 = vor.u32 %v3546_v1, %v2582_v2  ;;  %v3558_v2 = vld [vmem:[#allocation5 + $0x1d4] sm:$0xf] }
  0x80   :  { %1932 = vmatpush.bf16.msrb.mxu2 %v3349_v20  ;;  %1901 = vmatmul.bf16.vlgmr.msra.gmra.mxu3 %v4063_v33  ;;  %v3381_v20 = vor.u32 %v3747_v11, %v3380_v10  ;;  %v3245_v28 = vor.u32 %v3713_v21, %v3244_v18  ;;  %v408_v10 = vunpack.c.l.b16 %v118_v59  ;;  %v409_v11 = vunpack.c.h.b16 %v118_v59  ;;  %v3512_v18 = vld [vmem:[#allocation5 + $0x64] sm:$0xf]  ;;  %v2430_v59 = vld [vmem:[#allocation5 + $0x48] sm:$0xf0] }
  0x81   :  { %1945 = vmatpush.bf16.msrb.mxu3 %v3413_v24  ;;  %v3372_v24 = vld [vmem:[#allocation5 + $0x7a0] sm:$0xf]  ;;  %v3528_v21 = vld [vmem:[#allocation5 + $0xe4] sm:$0xf] }
  0x82   :  { %1907 = vmatpush.bf16.msrb.mxu0 %v3213_v34  ;;  %v3695_v34 = vld [vmem:[#allocation5 + $0x614] sm:$0xf0] }
  0x83   :  { %1920 = vmatpush.bf16.msrb.mxu1 %v3277_v36  ;;  %v3236_v36 = vld [vmem:[#allocation5 + $0x690] sm:$0xf]  ;;  %v3173_v47 = vor.u32 %v3695_v34, %v3172_v32  ;;  %v3420_v32 = vld [vmem:[#allocation5 + $0x800] sm:$0xf]  ;;  %v3757_v34 = vld [vmem:[#allocation5 + $0x804] sm:$0xf0] }
  0x84   :  { %1933 = vmatpush.bf16.msrb.mxu2 %v3341_v37  ;;  %v3373_v37 = vor.u32 %v3745_v26, %v3372_v24  ;;  %v2510_v24 = vld [vmem:[#allocation5 + $0xe8] sm:$0xf0]  ;;  %v3544_v26 = vld [vmem:[#allocation5 + $0x164] sm:$0xf] }
  0x85   :  { %1946 = vmatpush.bf16.msrb.mxu3 %v3405_v43  ;;  %v3364_v43 = vld [vmem:[#allocation5 + $0x790] sm:$0xf] }
  0x86   :  { %1908 = vmatpush.bf16.msrb.mxu0 %v3205_v50  ;;  %v3709_v50 = vld [vmem:[#allocation5 + $0x684] sm:$0xf0] }
  0x87   :  { %1921 = vmatpush.bf16.msrb.mxu1 %v3269_v51  ;;  %v3237_v51 = vor.u32 %v3711_v38, %v3236_v36  ;;  %v3562_v38 = vld [vmem:[#allocation5 + $0x1f4] sm:$0xf] }
  0x88   :  { %1934 = vmatpush.bf16.msrb.mxu2 %v3333_v52  ;;  %v3301_v52 = vor.u32 %v3727_v40, %v3300_v39  ;;  %v2646_v39 = vld [vmem:[#allocation5 + $0x1f8] sm:$0xf0]  ;;  %v2513_v40 = vor.u32 %v3528_v21, %v2510_v24  ;;  %v2622_v21 = vld [vmem:[#allocation5 + $0x1c8] sm:$0xf0] }
  0x89   :  { %1947 = vmatpush.bf16.msrb.mxu3 %v3397_v56  ;;  %v3365_v56 = vor.u32 %v3743_v45, %v3364_v43  ;;  %v3510_v45 = vld [vmem:[#allocation5 + $0x54] sm:$0xf] }
  0x8a   :  { %1909 = vmatpush.bf16.msrb.mxu0 %v3197_v62  ;;  %v3530_v62 = vld [vmem:[#allocation5 + $0xf4] sm:$0xf] }
  0x8b   :  { %1922 = vmatpush.bf16.msrb.mxu1 %v3261_v63  ;;  %v3165_v63 = vor.u32 %v3693_v48, %v3164_v46  ;;  %v2438_v46 = vld [vmem:[#allocation5 + $0x58] sm:$0xf0]  ;;  %v3421_v48 = vor.u32 %v3757_v34, %v3420_v32  ;;  %v3520_v32 = vld [vmem:[#allocation5 + $0xa4] sm:$0xf]  ;;  %v2478_v34 = vld [vmem:[#allocation5 + $0xa8] sm:$0xf0] }
  0x8c   :  { %1935 = vmatpush.bf16.msrb.mxu2 %v3325_v0  ;;  %v2518_v0 = vld [vmem:[#allocation5 + $0xf8] sm:$0xf0]  ;;  %v2441_v53 = vor.u32 %v3510_v45, %v2438_v46  ;;  %v3554_v45 = vld [vmem:[#allocation5 + $0x1b4] sm:$0xf] }
  0x8d   :  { %1948 = vmatpush.bf16.msrb.mxu3 %v3389_v4  ;;  %v3229_v4 = vor.u32 %v3709_v50, %v3228_v49  ;;  %v2521_v16 = vor.u32 %v3530_v62, %v2518_v0  ;;  %v2502_v49 = vld [vmem:[#allocation5 + $0xd8] sm:$0xf0]  ;;  %v3542_v50 = vld [vmem:[#allocation5 + $0x154] sm:$0xf]  ;;  %v3540_v62 = vld [vmem:[#allocation5 + $0x144] sm:$0xf] }
  0x8e   :  { %1910 = vmatpush.bf16.msrb.mxu0 %v3189_v12  ;;  %v3357_v12 = vor.u32 %v3741_v58, %v3356_v57  ;;  %v3508_v58 = vld [vmem:[#allocation5 + $0x44] sm:$0xf]  ;;  %v2614_v46 = vld [vmem:[#allocation5 + $0x1b8] sm:$0xf0] }
  0x8f   :  { %1923 = vmatpush.bf16.msrb.mxu1 %v3253_v13  ;;  %v2457_v13 = vor.u32 %v3514_v60, %v2454_v61  ;;  %v3524_v60 = vld [vmem:[#allocation5 + $0xc4] sm:$0xf]  ;;  %v2494_v61 = vld [vmem:[#allocation5 + $0xc8] sm:$0xf0]  ;;  %v2433_v1 = vor.u32 %v3508_v58, %v2430_v59 }
  0x90   :  { %1936 = vmatpush.bf16.msrb.mxu2 %v3317_v15  ;;  %v411_v15 = vunpack.c.h.b16 %v119_v55  ;;  %v2638_v55 = vld [vmem:[#allocation5 + $0x1e8] sm:$0xf0]  ;;  %v3500_v59 = vld [vmem:[#allocation5 + $0x4] sm:$0xf] }
  0x91   :  { %1949 = vmatpush.bf16.msrb.mxu3 %v3381_v20  ;;  %v2446_v20 = vld [vmem:[#allocation5 + $0x68] sm:$0xf0]  ;;  %v2641_v0 = vor.u32 %v3560_v54, %v2638_v55  ;;  %v2534_v54 = vld [vmem:[#allocation5 + $0x118] sm:$0xf0]  ;;  %v2617_v55 = vor.u32 %v3554_v45, %v2614_v46  ;;  %v3626_v46 = vld [vmem:[#allocation5 + $0x3f4] sm:$0xf] }
  0x92   :  { %1911 = vmatpush.bf16.msrb.mxu0 %v3181_v27  ;;  %v2574_v27 = vld [vmem:[#allocation5 + $0x168] sm:$0xf0]  ;;  %v4075_v36 = vpack.c.b16 %v411_v15, %v411_v15  ;;  %v2550_v15 = vld [vmem:[#allocation5 + $0x138] sm:$0xf0] }
  0x93   :  { %1924 = vmatpush.bf16.msrb.mxu1 %v3245_v28  ;;  %v4071_v28 = vpack.c.b16 %v408_v10, %v408_v10  ;;  %v2577_v43 = vor.u32 %v3544_v26, %v2574_v27  ;;  %v2422_v10 = vld [vmem:[#allocation5 + $0x38] sm:$0xf0]  ;;  %v3504_v26 = vld [vmem:[#allocation5 + $0x24] sm:$0xf]  ;;  %v2414_v27 = vld [vmem:[#allocation5 + $0x28] sm:$0xf0] }
  0x94   :  { %1937 = vmatpush.bf16.msrb.mxu2 %v3309_v31  ;;  %v4073_v31 = vpack.c.b16 %v409_v11, %v409_v11  ;;  %v3522_v11 = vld [vmem:[#allocation5 + $0xb4] sm:$0xf]  ;;  %v2606_v58 = vld [vmem:[#allocation5 + $0x1a8] sm:$0xf0] }
  0x95   :  { %1950 = vmatpush.bf16.msrb.mxu3 %v3373_v37  ;;  %v2449_v37 = vor.u32 %v3512_v18, %v2446_v20  ;;  %v2425_v18 = vor.u32 %v3506_v9, %v2422_v10  ;;  %v3556_v20 = vld [vmem:[#allocation5 + $0x1c4] sm:$0xf] }
  0x96   :  { %1912 = vmatpush.bf16.msrb.mxu0 %v3173_v47  ;;  %v3526_v47 = vld [vmem:[#allocation5 + $0xd4] sm:$0xf] }
  0x97   :  { %1925 = vmatpush.bf16.msrb.mxu1 %v3237_v51  ;;  %v2566_v51 = vld [vmem:[#allocation5 + $0x158] sm:$0xf0] }
  0x98   :  { %1938 = vmatpush.bf16.msrb.mxu2 %v3301_v52  ;;  %v2649_v52 = vor.u32 %v3562_v38, %v2646_v39  ;;  %v2569_v57 = vor.u32 %v3542_v50, %v2566_v51  ;;  %v2542_v38 = vld [vmem:[#allocation5 + $0x128] sm:$0xf0]  ;;  %v2406_v50 = vld [vmem:[#allocation5 + $0x18] sm:$0xf0]  ;;  %v3518_v51 = vld [vmem:[#allocation5 + $0x94] sm:$0xf] }
  0x99   :  { %1951 = vmatpush.bf16.msrb.mxu3 %v3365_v56  ;;  %v2505_v56 = vor.u32 %v3526_v47, %v2502_v49  ;;  %v2481_v47 = vor.u32 %v3520_v32, %v2478_v34  ;;  %v3502_v49 = vld [vmem:[#allocation5 + $0x14] sm:$0xf]  ;;  %v3608_v34 = vld [vmem:[#allocation5 + $0x364] sm:$0xf] }
  0x9a   :  { %1913 = vmatpush.bf16.msrb.mxu0 %v3165_v63  ;;  %v2558_v63 = vld [vmem:[#allocation5 + $0x148] sm:$0xf0] }
  0x9b   :  { %1926 = vmatpush.bf16.msrb.mxu1 %v3229_v4  ;;  %v120_v4 = vld [vmem:[#allocation2 + $0x40] sm:$0xf]  ;;  %v2561_v6 = vor.u32 %v3540_v62, %v2558_v63  ;;  %v2398_v62 = vld [vmem:[#allocation5 + $0x8] sm:$0xf0]  ;;  %v3516_v63 = vld [vmem:[#allocation5 + $0x84] sm:$0xf] }
  0x9c   :  { %1939 = vmatpush.bf16.msrb.mxu2 %v3293_v5  ;;  %v2497_v5 = vor.u32 %v3524_v60, %v2494_v61  ;;  %v2401_v10 = vor.u32 %v3500_v59, %v2398_v62  ;;  %v3624_v59 = vld [vmem:[#allocation5 + $0x3e4] sm:$0xf] }
  0x9d   :  { %1952 = vmatpush.bf16.msrb.mxu3 %v3357_v12  ;;  %1914 = vmatmul.bf16.vlgmr.msrb.gmra.mxu0 %v4071_v28  ;;  %v2486_v12 = vld [vmem:[#allocation5 + $0xb8] sm:$0xf0] }
  0x9e   :  { %1964 = vmatpush.bf16.msra.mxu0 %v3429_v22  ;;  %1927 = vmatmul.bf16.vlgmr.msrb.gmra.mxu1 %v4073_v31  ;;  %v2489_v22 = vor.u32 %v3522_v11, %v2486_v12  ;;  %v3610_v11 = vld [vmem:[#allocation5 + $0x374] sm:$0xf]  ;;  %v2838_v12 = vld [vmem:[#allocation5 + $0x378] sm:$0xf0] }
  0x9f   :  { %1971 = vmatpush.bf16.msra.mxu1 %v2457_v13  ;;  %1940 = vmatmul.bf16.vlgmr.msrb.gmra.mxu2 %v4069_v23  ;;  %v3538_v13 = vld [vmem:[#allocation5 + $0x134] sm:$0xf] }
  0xa0   :  { %1984 = vmatpush.bf16.msra.mxu2 %v2521_v16  ;;  %1953 = vmatmul.bf16.vlgmr.msrb.gmra.mxu3 %v4075_v36  ;;  %v2633_v16 = vor.u32 %v3558_v2, %v2630_v3  ;;  %v2553_v24 = vor.u32 %v3538_v13, %v2550_v15  ;;  %v2526_v2 = vld [vmem:[#allocation5 + $0x108] sm:$0xf0]  ;;  %v3578_v3 = vld [vmem:[#allocation5 + $0x274] sm:$0xf] }
  0xa1   :  { %1997 = vmatpush.bf16.msra.mxu3 %v2585_v17  ;;  %v412_v17 = vunpack.c.l.b16 %v120_v4  ;;  %v2710_v4 = vld [vmem:[#allocation5 + $0x278] sm:$0xf0] }
  0xa2   :  { %1965 = vmatpush.bf16.msra.mxu0 %v3421_v48 }
  0xa3   :  { %1972 = vmatpush.bf16.msra.mxu1 %v2449_v37  ;;  %v3536_v37 = vld [vmem:[#allocation5 + $0x124] sm:$0xf]  ;;  %v4081_v39 = vpack.c.b16 %v412_v17, %v412_v17  ;;  %v2598_v17 = vld [vmem:[#allocation5 + $0x198] sm:$0xf0] }
  0xa4   :  { %1985 = vmatpush.bf16.msra.mxu2 %v2513_v40  ;;  %v2625_v40 = vor.u32 %v3556_v20, %v2622_v21  ;;  %v2545_v48 = vor.u32 %v3536_v37, %v2542_v38  ;;  %v3576_v21 = vld [vmem:[#allocation5 + $0x264] sm:$0xf]  ;;  %v2830_v37 = vld [vmem:[#allocation5 + $0x368] sm:$0xf0] }
  0xa5   :  { %1998 = vmatpush.bf16.msra.mxu3 %v2577_v43  ;;  %v2417_v43 = vor.u32 %v3504_v26, %v2414_v27  ;;  %v3592_v26 = vld [vmem:[#allocation5 + $0x2e4] sm:$0xf]  ;;  %v2766_v27 = vld [vmem:[#allocation5 + $0x2e8] sm:$0xf0] }
  0xa6   :  { %2010 = vmatpush.bf16.msrb.mxu0 %v2649_v52  ;;  %v2470_v52 = vld [vmem:[#allocation5 + $0x98] sm:$0xf0]  ;;  %v3548_v38 = vld [vmem:[#allocation5 + $0x184] sm:$0xf]  ;;  %v2769_v45 = vor.u32 %v3592_v26, %v2766_v27 }
  0xa7   :  { %1973 = vmatpush.bf16.msra.mxu1 %v2441_v53  ;;  %v3534_v53 = vld [vmem:[#allocation5 + $0x114] sm:$0xf]  ;;  %v2473_v60 = vor.u32 %v3518_v51, %v2470_v52  ;;  %v2758_v52 = vld [vmem:[#allocation5 + $0x2d8] sm:$0xf0]  ;;  %v3568_v26 = vld [vmem:[#allocation5 + $0x224] sm:$0xf] }
  0xa8   :  { %1986 = vmatpush.bf16.msra.mxu2 %v2505_v56  ;;  %v2409_v56 = vor.u32 %v3502_v49, %v2406_v50  ;;  %v2537_v61 = vor.u32 %v3534_v53, %v2534_v54  ;;  %v2833_v49 = vor.u32 %v3608_v34, %v2830_v37  ;;  %v2694_v50 = vld [vmem:[#allocation5 + $0x258] sm:$0xf0]  ;;  %v3590_v51 = vld [vmem:[#allocation5 + $0x2d4] sm:$0xf]  ;;  %v2670_v34 = vld [vmem:[#allocation5 + $0x228] sm:$0xf0] }
  0xa9   :  { %1999 = vmatpush.bf16.msra.mxu3 %v2569_v57  ;;  %v3552_v57 = vld [vmem:[#allocation5 + $0x1a4] sm:$0xf]  ;;  %v3606_v54 = vld [vmem:[#allocation5 + $0x354] sm:$0xf] }
  0xaa   :  { %2011 = vmatpush.bf16.msrb.mxu0 %v2641_v0  ;;  %v2462_v0 = vld [vmem:[#allocation5 + $0x88] sm:$0xf0]  ;;  %v2609_v9 = vor.u32 %v3552_v57, %v2606_v58  ;;  %v2761_v58 = vor.u32 %v3590_v51, %v2758_v52  ;;  %v3584_v37 = vld [vmem:[#allocation5 + $0x2a4] sm:$0xf]  ;;  %v2870_v51 = vld [vmem:[#allocation5 + $0x3b8] sm:$0xf0] }
  0xab   :  { %1974 = vmatpush.bf16.msra.mxu1 %v2433_v1  ;;  %v3532_v1 = vld [vmem:[#allocation5 + $0x104] sm:$0xf]  ;;  %v2465_v13 = vor.u32 %v3516_v63, %v2462_v0  ;;  %v2686_v63 = vld [vmem:[#allocation5 + $0x248] sm:$0xf0]  ;;  %v3566_v52 = vld [vmem:[#allocation5 + $0x214] sm:$0xf] }
  0xac   :  { %1987 = vmatpush.bf16.msra.mxu2 %v2497_v5  ;;  %v3594_v5 = vld [vmem:[#allocation5 + $0x2f4] sm:$0xf]  ;;  %v2529_v15 = vor.u32 %v3532_v1, %v2526_v2  ;;  %v2750_v0 = vld [vmem:[#allocation5 + $0x2c8] sm:$0xf0]  ;;  %v3604_v1 = vld [vmem:[#allocation5 + $0x344] sm:$0xf] }
  0xad   :  { %2000 = vmatpush.bf16.msra.mxu3 %v2561_v6  ;;  %3434 = vmatmul.msk.bf16.vlgmr.msra.gmra.mxu0 %vm1746_vm0, %v4081_v39  ;;  %v2774_v6 = vld [vmem:[#allocation5 + $0x2f8] sm:$0xf0]  ;;  %v2814_v2 = vld [vmem:[#allocation5 + $0x348] sm:$0xf0] }
  0xae   :  { %2012 = vmatpush.bf16.msrb.mxu0 %v2633_v16  ;;  %v3550_v16 = vld [vmem:[#allocation5 + $0x194] sm:$0xf]  ;;  %v2777_v20 = vor.u32 %v3594_v5, %v2774_v6  ;;  %v2886_v6 = vld [vmem:[#allocation5 + $0x3d8] sm:$0xf0] }
  0xaf   :  { %1975 = vmatpush.bf16.msra.mxu1 %v2425_v18  ;;  %v2713_v18 = vor.u32 %v3578_v3, %v2710_v4  ;;  %v2601_v32 = vor.u32 %v3550_v16, %v2598_v17  ;;  %v4088_v3 = vld [vmem:[#allocation7] sm:$0x3]  ;;  %v3602_v16 = vld [vmem:[#allocation5 + $0x334] sm:$0xf]  ;;  %v2806_v17 = vld [vmem:[#allocation5 + $0x338] sm:$0xf0] }
  0xb0   :  { %1988 = vmatpush.bf16.msra.mxu2 %v2489_v22  ;;  %v2841_v22 = vor.u32 %v3610_v11, %v2838_v12  ;;  %v2817_v11 = vor.u32 %v3604_v1, %v2814_v2  ;;  %v3586_v12 = vld [vmem:[#allocation5 + $0x2b4] sm:$0xf]  ;;  %v3564_v2 = vld [vmem:[#allocation5 + $0x204] sm:$0xf] }
  0xb1   :  { %2001 = vmatpush.bf16.msra.mxu3 %v2553_v24  ;;  %v2702_v24 = vld [vmem:[#allocation5 + $0x268] sm:$0xf0] }
  0xb2   :  { %2013 = vmatpush.bf16.msrb.mxu0 %v2625_v40  ;;  %v2590_v40 = vld [vmem:[#allocation5 + $0x188] sm:$0xf0] }
  0xb3   :  { %1976 = vmatpush.bf16.msra.mxu1 %v2417_v43  ;;  %v2705_v43 = vor.u32 %v3576_v21, %v2702_v24  ;;  %v2593_v53 = vor.u32 %v3548_v38, %v2590_v40  ;;  %v2878_v24 = vld [vmem:[#allocation5 + $0x3c8] sm:$0xf0] }
  0xb4   :  { %1989 = vmatpush.bf16.msra.mxu2 %v2481_v47  ;;  %v2902_v47 = vld [vmem:[#allocation5 + $0x3f8] sm:$0xf0]  ;;  %v2734_v38 = vld [vmem:[#allocation5 + $0x2a8] sm:$0xf0] }
  0xb5   :  { %2002 = vmatpush.bf16.msra.mxu3 %v2545_v48  ;;  %v3574_v48 = vld [vmem:[#allocation5 + $0x254] sm:$0xf] }
  0xb6   :  { %2014 = vmatpush.bf16.msrb.mxu0 %v2617_v55  ;;  %v2822_v55 = vld [vmem:[#allocation5 + $0x358] sm:$0xf0]  ;;  %v2697_v57 = vor.u32 %v3574_v48, %v2694_v50  ;;  %v2673_v48 = vor.u32 %v3568_v26, %v2670_v34  ;;  %v3618_v50 = vld [vmem:[#allocation5 + $0x3b4] sm:$0xf] }
  0xb7   :  { %1977 = vmatpush.bf16.msra.mxu1 %v2409_v56  ;;  %v2905_v56 = vor.u32 %v3626_v46, %v2902_v47  ;;  %v2825_v62 = vor.u32 %v3606_v54, %v2822_v55  ;;  %v2662_v54 = vld [vmem:[#allocation5 + $0x218] sm:$0xf0]  ;;  %v3582_v55 = vld [vmem:[#allocation5 + $0x294] sm:$0xf] }
  0xb8   :  { %1990 = vmatpush.bf16.msra.mxu2 %v2473_v60  ;;  %v2894_v60 = vld [vmem:[#allocation5 + $0x3e8] sm:$0xf0]  ;;  %v3614_v26 = vld [vmem:[#allocation5 + $0x394] sm:$0xf] }
  0xb9   :  { %2003 = vmatpush.bf16.msra.mxu3 %v2537_v61  ;;  %v3572_v61 = vld [vmem:[#allocation5 + $0x244] sm:$0xf] }
  0xba   :  { %2015 = vmatpush.bf16.msrb.mxu0 %v2609_v9  ;;  %v2689_v4 = vor.u32 %v3572_v61, %v2686_v63  ;;  %v3570_v9 = vld [vmem:[#allocation5 + $0x234] sm:$0xf]  ;;  %v1759_v27 = vpop.f32.mrf.mxu0  ;;  %v3616_v63 = vld [vmem:[#allocation5 + $0x3a4] sm:$0xf] }
  0xbb   :  { %1978 = vmatpush.bf16.msra.mxu1 %v2401_v10  ;;  %v2678_v10 = vld [vmem:[#allocation5 + $0x238] sm:$0xf0]  ;;  %v1772_v40 = vpop.f32.mrf.mxu1 }
  0xbc   :  { %1991 = vmatpush.bf16.msra.mxu2 %v2465_v13  ;;  %v2742_v13 = vld [vmem:[#allocation5 + $0x2b8] sm:$0xf0] }
  0xbd   :  { %2004 = vmatpush.bf16.msra.mxu3 %v2529_v15  ;;  %v383_v15 = vperm.slane %v4088_v3, 0  ;;  %v2745_v21 = vor.u32 %v3586_v12, %v2742_v13  ;;  %v3642_v13 = vld [vmem:[#allocation5 + $0x474] sm:$0xf] }
  0xbe   :  { %1979 = vmatmul.bf16.vlgmr.msra.gmra.mxu1 %v4037_v14  ;;  %2016 = vmatpush.bf16.msrb.mxu0 %v2601_v32  ;;  %v3588_v14 = vld [vmem:[#allocation5 + $0x2c4] sm:$0xf]  ;;  %v2809_v32 = vor.u32 %v3602_v16, %v2806_v17  ;;  %v3658_v16 = vld [vmem:[#allocation5 + $0x4f4] sm:$0xf] }
  0xbf   :  { %2023 = vmatpush.bf16.msrb.mxu1 %v2713_v18  ;;  %1992 = vmatmul.bf16.vlgmr.msra.gmra.mxu2 %v4040_v19  ;;  %v2897_v19 = vor.u32 %v3624_v59, %v2894_v60  ;;  %v2753_v5 = vor.u32 %v3588_v14, %v2750_v0  ;;  %v2790_v59 = vld [vmem:[#allocation5 + $0x318] sm:$0xf0]  ;;  %v2862_v14 = vld [vmem:[#allocation5 + $0x3a8] sm:$0xf0]  ;;  %v2665_v0 = vor.u32 %v3566_v52, %v2662_v54  ;;  %v3690_v54 = vld [vmem:[#allocation5 + $0x5f4] sm:$0xf] }
  0xc0   :  { %2036 = vmatpush.bf16.msrb.mxu2 %v2777_v20  ;;  %2005 = vmatmul.bf16.vlgmr.msra.gmra.mxu3 %v4033_v7  ;;  %v3622_v7 = vld [vmem:[#allocation5 + $0x3d4] sm:$0xf]  ;;  %v2681_v20 = vor.u32 %v3570_v9, %v2678_v10  ;;  %v2718_v9 = vld [vmem:[#allocation5 + $0x288] sm:$0xf0]  ;;  %v3596_v10 = vld [vmem:[#allocation5 + $0x304] sm:$0xf]  ;;  %v2865_v17 = vor.u32 %v3616_v63, %v2862_v14 }
  0xc1   :  { %2049 = vmatpush.bf16.msrb.mxu3 %v2841_v22  ;;  %v2889_v18 = vor.u32 %v3622_v7, %v2886_v6  ;;  %v3620_v22 = vld [vmem:[#allocation5 + $0x3c4] sm:$0xf]  ;;  %v2846_v52 = vld [vmem:[#allocation5 + $0x388] sm:$0xf0]  ;;  %v3670_v63 = vld [vmem:[#allocation5 + $0x554] sm:$0xf] }
  0xc2   :  { %2017 = vmatpush.bf16.msrb.mxu0 %v2593_v53  ;;  %v2881_v46 = vor.u32 %v3620_v22, %v2878_v24  ;;  %v3580_v7 = vld [vmem:[#allocation5 + $0x284] sm:$0xf]  ;;  %v3078_v14 = vld [vmem:[#allocation5 + $0x558] sm:$0xf0] }
  0xc3   :  { %2024 = vmatpush.bf16.msrb.mxu1 %v2705_v43  ;;  %v3600_v43 = vld [vmem:[#allocation5 + $0x324] sm:$0xf]  ;;  %v1798_v61 = vpop.f32.mrf.mxu3  ;;  %v1774_v12 = vpop.f32.mrf.mxu1  ;;  %v2721_v24 = vor.u32 %v3580_v7, %v2718_v9  ;;  %v2942_v9 = vld [vmem:[#allocation5 + $0x448] sm:$0xf0] }
  0xc4   :  { %2037 = vmatpush.bf16.msrb.mxu2 %v2769_v45  ;;  %v2798_v45 = vld [vmem:[#allocation5 + $0x328] sm:$0xf0] }
  0xc5   :  { %2050 = vmatpush.bf16.msrb.mxu3 %v2833_v49  ;;  %2018 = vmatmul.bf16.vlgmr.msrb.gmra.mxu0 %v4035_v8  ;;  %v1760_v8 = vadd.f32 %v1759_v27, %v383_v15  ;;  %v2737_v49 = vor.u32 %v3584_v37, %v2734_v38  ;;  %v2801_v53 = vor.u32 %v3600_v43, %v2798_v45  ;;  %v2966_v15 = vld [vmem:[#allocation5 + $0x478] sm:$0xf0]  ;;  %v2958_v43 = vld [vmem:[#allocation5 + $0x468] sm:$0xf0]  ;;  %v3656_v45 = vld [vmem:[#allocation5 + $0x4e4] sm:$0xf] }
  0xc6   :  { %2062 = vmatpush.bf16.msra.mxu0 %v2905_v56  ;;  %v2726_v56 = vld [vmem:[#allocation5 + $0x298] sm:$0xf0]  ;;  %v2969_v34 = vor.u32 %v3642_v13, %v2966_v15  ;;  %v3070_v12 = vld [vmem:[#allocation5 + $0x548] sm:$0xf0] }
  0xc7   :  { %2025 = vmatpush.bf16.msrb.mxu1 %v2697_v57  ;;  %v1773_v47 = vadd.f32 %v1772_v40, %v1760_v8  ;;  %v1785_v57 = vpop.f32.mrf.mxu2  ;;  %v2729_v1 = vor.u32 %v3582_v55, %v2726_v56  ;;  %v2854_v27 = vld [vmem:[#allocation5 + $0x398] sm:$0xf0]  ;;  %v3640_v40 = vld [vmem:[#allocation5 + $0x464] sm:$0xf] }
  0xc8   :  { %2038 = vmatpush.bf16.msrb.mxu2 %v2761_v58  ;;  %v3598_v58 = vld [vmem:[#allocation5 + $0x314] sm:$0xf]  ;;  %v3158_v55 = vld [vmem:[#allocation5 + $0x5f8] sm:$0xf0] }
  0xc9   :  { %2051 = vmatpush.bf16.msrb.mxu3 %v2825_v62  ;;  %v1786_v60 = vadd.f32 %v1785_v57, %v1773_v47  ;;  %v2873_v62 = vor.u32 %v3618_v50, %v2870_v51  ;;  %v2793_v6 = vor.u32 %v3598_v58, %v2790_v59  ;;  %v2857_v47 = vor.u32 %v3614_v26, %v2854_v27  ;;  %v3086_v50 = vld [vmem:[#allocation5 + $0x568] sm:$0xf0]  ;;  %v3612_v51 = vld [vmem:[#allocation5 + $0x384] sm:$0xf]  ;;  %v3638_v58 = vld [vmem:[#allocation5 + $0x454] sm:$0xf] }
  0xca   :  { %2063 = vmatpush.bf16.msra.mxu0 %v2897_v19  ;;  %v2654_v19 = vld [vmem:[#allocation5 + $0x208] sm:$0xf0]  ;;  %v2950_v59 = vld [vmem:[#allocation5 + $0x458] sm:$0xf0]  ;;  %v3666_v26 = vld [vmem:[#allocation5 + $0x534] sm:$0xf] }
  0xcb   :  { %2026 = vmatpush.bf16.msrb.mxu1 %v2689_v4  ;;  %v4092_v4 = vadd.f32 %v1798_v61, %v1786_v60  ;;  %v2657_v22 = vor.u32 %v3564_v2, %v2654_v19  ;;  %v3654_v60 = vld [vmem:[#allocation5 + $0x4d4] sm:$0xf]  ;;  %v2849_v61 = vor.u32 %v3612_v51, %v2846_v52  ;;  %v3688_v2 = vld [vmem:[#allocation5 + $0x5e4] sm:$0xf]  ;;  %v3150_v19 = vld [vmem:[#allocation5 + $0x5e8] sm:$0xf0] }
  0xcc   :  { %2039 = vmatpush.bf16.msrb.mxu2 %v2753_v5  ;;  %v1761_v5 = vpop.f32.mrf.mxu0  ;;  %v3142_v15 = vld [vmem:[#allocation5 + $0x5d8] sm:$0xf0] }
  0xcd   :  { %2052 = vmatpush.bf16.msrb.mxu3 %v2817_v11  ;;  %v2782_v11 = vld [vmem:[#allocation5 + $0x308] sm:$0xf0]  ;;  %v3081_v5 = vor.u32 %v3670_v63, %v3078_v14  ;;  %v3062_v27 = vld [vmem:[#allocation5 + $0x538] sm:$0xf0]  ;;  %v3662_v63 = vld [vmem:[#allocation5 + $0x514] sm:$0xf] }
  0xce   :  { %2064 = vmatpush.bf16.msra.mxu0 %v2889_v18  ;;  %v3030_v18 = vld [vmem:[#allocation5 + $0x4f8] sm:$0xf0] }
  0xcf   :  { %2027 = vmatpush.bf16.msrb.mxu1 %v2681_v20  ;;  %v3674_v20 = vld [vmem:[#allocation5 + $0x574] sm:$0xf]  ;;  %v1787_v37 = vpop.f32.mrf.mxu2  ;;  %v3033_v38 = vor.u32 %v3658_v16, %v3030_v18  ;;  %v3046_v14 = vld [vmem:[#allocation5 + $0x518] sm:$0xf0] }
  0xd0   :  { %2040 = vmatpush.bf16.msrb.mxu2 %v2745_v21  ;;  %v3094_v21 = vld [vmem:[#allocation5 + $0x578] sm:$0xf0] }
  0xd1   :  { %2053 = vmatpush.bf16.msrb.mxu3 %v2809_v32  ;;  %v2785_v32 = vor.u32 %v3596_v10, %v2782_v11  ;;  %v3097_v8 = vor.u32 %v3674_v20, %v3094_v21  ;;  %v3006_v10 = vld [vmem:[#allocation5 + $0x4c8] sm:$0xf0]  ;;  %v3668_v11 = vld [vmem:[#allocation5 + $0x544] sm:$0xf]  ;;  %v3634_v20 = vld [vmem:[#allocation5 + $0x434] sm:$0xf] }
  0xd2   :  { %2065 = vmatpush.bf16.msra.mxu0 %v2881_v46  ;;  %v1800_v46 = vpop.f32.mrf.mxu3  ;;  %v2934_v21 = vld [vmem:[#allocation5 + $0x438] sm:$0xf0] }
  0xd3   :  { %2028 = vmatpush.bf16.msrb.mxu1 %v2673_v48  ;;  %v3022_v48 = vld [vmem:[#allocation5 + $0x4e8] sm:$0xf0]  ;;  %v2937_v37 = vor.u32 %v3634_v20, %v2934_v21  ;;  %v3286_v20 = vld [vmem:[#allocation5 + $0x6f8] sm:$0xf0]  ;;  %v3738_v21 = vld [vmem:[#allocation5 + $0x774] sm:$0xf] }
  0xd4   :  { %2041 = vmatpush.bf16.msrb.mxu2 %v2737_v49  ;;  %v3672_v49 = vld [vmem:[#allocation5 + $0x564] sm:$0xf]  ;;  %v3025_v56 = vor.u32 %v3656_v45, %v3022_v48  ;;  %v2926_v46 = vld [vmem:[#allocation5 + $0x428] sm:$0xf0] }
  0xd5   :  { %2054 = vmatpush.bf16.msrb.mxu3 %v2801_v53  ;;  %v2961_v53 = vor.u32 %v3640_v40, %v2958_v43  ;;  %v3089_v57 = vor.u32 %v3672_v49, %v3086_v50  ;;  %v3065_v43 = vor.u32 %v3666_v26, %v3062_v27  ;;  %v3632_v45 = vld [vmem:[#allocation5 + $0x424] sm:$0xf]  ;;  %v3054_v50 = vld [vmem:[#allocation5 + $0x528] sm:$0xf0]  ;;  %v3350_v26 = vld [vmem:[#allocation5 + $0x778] sm:$0xf0] }
  0xd6   :  { %2066 = vmatpush.bf16.msra.mxu0 %v2873_v62  ;;  %v3014_v62 = vld [vmem:[#allocation5 + $0x4d8] sm:$0xf0]  ;;  %v3664_v49 = vld [vmem:[#allocation5 + $0x524] sm:$0xf]  ;;  %v3678_v27 = vld [vmem:[#allocation5 + $0x594] sm:$0xf] }
  0xd7   :  { %2029 = vmatpush.bf16.msrb.mxu1 %v2665_v0  ;;  %v3161_v0 = vor.u32 %v3690_v54, %v3158_v55  ;;  %v3017_v7 = vor.u32 %v3654_v60, %v3014_v62  ;;  %v3682_v54 = vld [vmem:[#allocation5 + $0x5b4] sm:$0xf]  ;;  %v3126_v55 = vld [vmem:[#allocation5 + $0x5b8] sm:$0xf0] }
  0xd8   :  { %2042 = vmatpush.bf16.msrb.mxu2 %v2729_v1  ;;  %v2953_v1 = vor.u32 %v3638_v58, %v2950_v59  ;;  %v3630_v58 = vld [vmem:[#allocation5 + $0x414] sm:$0xf]  ;;  %v2918_v59 = vld [vmem:[#allocation5 + $0x418] sm:$0xf0] }
  0xd9   :  { %2055 = vmatpush.bf16.msrb.mxu3 %v2793_v6  ;;  %v3636_v6 = vld [vmem:[#allocation5 + $0x444] sm:$0xf]  ;;  %v3646_v60 = vld [vmem:[#allocation5 + $0x494] sm:$0xf]  ;;  %v2982_v62 = vld [vmem:[#allocation5 + $0x498] sm:$0xf0] }
  0xda   :  { %2067 = vmatpush.bf16.msra.mxu0 %v2865_v17  ;;  %v2945_v13 = vor.u32 %v3636_v6, %v2942_v9  ;;  %v3073_v17 = vor.u32 %v3668_v11, %v3070_v12  ;;  %v4097_v18 = vpop.f32.mrf.mxu0  ;;  %v2910_v6 = vld [vmem:[#allocation5 + $0x408] sm:$0xf0]  ;;  %v2985_v9 = vor.u32 %v3646_v60, %v2982_v62  ;;  %v3660_v12 = vld [vmem:[#allocation5 + $0x504] sm:$0xf]  ;;  %v3206_v62 = vld [vmem:[#allocation5 + $0x658] sm:$0xf0] }
  0xdb   :  { %2030 = vmatpush.bf16.msrb.mxu1 %v2657_v22  ;;  %v3650_v22 = vld [vmem:[#allocation5 + $0x4b4] sm:$0xf]  ;;  %v2974_v11 = vld [vmem:[#allocation5 + $0x488] sm:$0xf0] }
  0xdc   :  { %2043 = vmatpush.bf16.msrb.mxu2 %v2721_v24  ;;  %v2998_v24 = vld [vmem:[#allocation5 + $0x4b8] sm:$0xf0] }
  0xdd   :  { %2056 = vmatpush.bf16.msrb.mxu3 %v2785_v32  ;;  %v4100_v32 = vpop.f32.mrf.mxu1  ;;  %v3001_v40 = vor.u32 %v3650_v22, %v2998_v24 }
  0xde   :  { %2068 = vmatpush.bf16.msra.mxu0 %v2857_v47  ;;  %2031 = vmatmul.bf16.vlgmr.msrb.gmra.mxu1 %v4047_v41  ;;  %v3686_v41 = vld [vmem:[#allocation5 + $0x5d4] sm:$0xf]  ;;  %v3648_v47 = vld [vmem:[#allocation5 + $0x4a4] sm:$0xf] }
  0xdf   :  { %2075 = vmatpush.bf16.msra.mxu1 %v2969_v34  ;;  %2044 = vmatmul.bf16.vlgmr.msrb.gmra.mxu2 %v4051_v44  ;;  %v3652_v44 = vld [vmem:[#allocation5 + $0x4c4] sm:$0xf]  ;;  %v3145_v34 = vor.u32 %v3686_v41, %v3142_v15  ;;  %v3222_v41 = vld [vmem:[#allocation5 + $0x678] sm:$0xf0] }
  0xe0   :  { %2088 = vmatpush.bf16.msra.mxu2 %v3033_v38  ;;  %2057 = vmatmul.bf16.vlgmr.msrb.gmra.mxu3 %v4045_v35  ;;  %v3153_v35 = vor.u32 %v3688_v2, %v3150_v19  ;;  %v3009_v16 = vor.u32 %v3652_v44, %v3006_v10  ;;  %v3684_v38 = vld [vmem:[#allocation5 + $0x5c4] sm:$0xf]  ;;  %v2921_v19 = vor.u32 %v3630_v58, %v2918_v59  ;;  %v3702_v59 = vld [vmem:[#allocation5 + $0x654] sm:$0xf] }
  0xe1   :  { %2101 = vmatpush.bf16.msra.mxu3 %v3097_v8  ;;  %v3134_v8 = vld [vmem:[#allocation5 + $0x5c8] sm:$0xf0]  ;;  %v3680_v2 = vld [vmem:[#allocation5 + $0x5a4] sm:$0xf]  ;;  %v3049_v44 = vor.u32 %v3662_v63, %v3046_v14  ;;  %v3718_v63 = vld [vmem:[#allocation5 + $0x6d4] sm:$0xf] }
  0xe2   :  { %2069 = vmatpush.bf16.msra.mxu0 %v2849_v61  ;;  %v4102_v48 = vpop.f32.mrf.mxu2  ;;  %v3137_v51 = vor.u32 %v3684_v38, %v3134_v8  ;;  %v1813_v61 = vpop.f32.mrf.mxu0  ;;  %v3644_v10 = vld [vmem:[#allocation5 + $0x484] sm:$0xf]  ;;  %v3270_v14 = vld [vmem:[#allocation5 + $0x6d8] sm:$0xf0] }
  0xe3   :  { %2076 = vmatpush.bf16.msra.mxu1 %v2961_v53  ;;  %v4104_v52 = vpop.f32.mrf.mxu3  ;;  %v2929_v53 = vor.u32 %v3632_v45, %v2926_v46  ;;  %v3214_v45 = vld [vmem:[#allocation5 + $0x668] sm:$0xf0]  ;;  %v3353_v46 = vor.u32 %v3738_v21, %v3350_v26  ;;  %v3254_v26 = vld [vmem:[#allocation5 + $0x6b8] sm:$0xf0] }
  0xe4   :  { %2089 = vmatpush.bf16.msra.mxu2 %v3025_v56 }
  0xe5   :  { %2102 = vmatpush.bf16.msra.mxu3 %v3089_v57  ;;  %2070 = vmatmul.bf16.vlgmr.msra.gmra.mxu0 %v4049_v42  ;;  %v2990_v42 = vld [vmem:[#allocation5 + $0x4a8] sm:$0xf0]  ;;  %v3057_v57 = vor.u32 %v3664_v49, %v3054_v50  ;;  %v3736_v50 = vld [vmem:[#allocation5 + $0x764] sm:$0xf] }
  0xe6   :  { %2114 = vmatpush.bf16.msrb.mxu0 %v3161_v0  ;;  %v2993_v56 = vor.u32 %v3648_v47, %v2990_v42  ;;  %v1826_v0 = vpop.f32.mrf.mxu1  ;;  %v3720_v42 = vld [vmem:[#allocation5 + $0x6e4] sm:$0xf]  ;;  %v3278_v49 = vld [vmem:[#allocation5 + $0x6e8] sm:$0xf0] }
  0xe7   :  { %2077 = vmatpush.bf16.msra.mxu1 %v2953_v1  ;;  %v3129_v1 = vor.u32 %v3682_v54, %v3126_v55  ;;  %v3102_v54 = vld [vmem:[#allocation5 + $0x588] sm:$0xf0]  ;;  %v3754_v55 = vld [vmem:[#allocation5 + $0x7f4] sm:$0xf]  ;;  %v3281_v58 = vor.u32 %v3720_v42, %v3278_v49 }
  0xe8   :  { %2090 = vmatpush.bf16.msra.mxu2 %v3017_v7  ;;  %v3118_v7 = vld [vmem:[#allocation5 + $0x5a8] sm:$0xf0] }
  0xe9   :  { %2103 = vmatpush.bf16.msra.mxu3 %v3081_v5  ;;  %v3628_v5 = vld [vmem:[#allocation5 + $0x404] sm:$0xf]  ;;  %v3246_v42 = vld [vmem:[#allocation5 + $0x6a8] sm:$0xf0] }
  0xea   :  { %2115 = vmatpush.bf16.msrb.mxu0 %v3153_v35  ;;  %v3038_v35 = vld [vmem:[#allocation5 + $0x508] sm:$0xf0]  ;;  %v1839_v15 = vpop.f32.mrf.mxu2  ;;  %v2913_v24 = vor.u32 %v3628_v5, %v2910_v6  ;;  %v3209_v5 = vor.u32 %v3702_v59, %v3206_v62  ;;  %v3273_v6 = vor.u32 %v3718_v63, %v3270_v14  ;;  %v3694_v59 = vld [vmem:[#allocation5 + $0x614] sm:$0xf]  ;;  %v3174_v62 = vld [vmem:[#allocation5 + $0x618] sm:$0xf0] }
  0xeb   :  { %2078 = vmatpush.bf16.msra.mxu1 %v2945_v13  ;;  %v3706_v13 = vld [vmem:[#allocation5 + $0x674] sm:$0xf]  ;;  %v1852_v22 = vpop.f32.mrf.mxu3  ;;  %v3041_v38 = vor.u32 %v3660_v12, %v3038_v35  ;;  %v3732_v12 = vld [vmem:[#allocation5 + $0x744] sm:$0xf]  ;;  %v3326_v35 = vld [vmem:[#allocation5 + $0x748] sm:$0xf0] }
  0xec   :  { %2091 = vmatpush.bf16.msra.mxu2 %v3009_v16  ;;  %v3121_v16 = vor.u32 %v3680_v2, %v3118_v7  ;;  %v3225_v8 = vor.u32 %v3706_v13, %v3222_v41  ;;  %v3334_v2 = vld [vmem:[#allocation5 + $0x758] sm:$0xf0]  ;;  %v3406_v7 = vld [vmem:[#allocation5 + $0x7e8] sm:$0xf0]  ;;  %v3750_v13 = vld [vmem:[#allocation5 + $0x7d4] sm:$0xf] }
  0xed   :  { %2104 = vmatpush.bf16.msra.mxu3 %v3073_v17  ;;  %v3722_v17 = vld [vmem:[#allocation5 + $0x6f4] sm:$0xf]  ;;  %v3398_v41 = vld [vmem:[#allocation5 + $0x7d8] sm:$0xf0] }
  0xee   :  { %2116 = vmatpush.bf16.msrb.mxu0 %v3145_v34  ;;  %v3110_v34 = vld [vmem:[#allocation5 + $0x598] sm:$0xf0]  ;;  %v3710_v63 = vld [vmem:[#allocation5 + $0x694] sm:$0xf] }
  0xef   :  { %2079 = vmatpush.bf16.msra.mxu1 %v2937_v37  ;;  %v2977_v37 = vor.u32 %v3644_v10, %v2974_v11  ;;  %v3113_v47 = vor.u32 %v3678_v27, %v3110_v34  ;;  %v3198_v10 = vld [vmem:[#allocation5 + $0x648] sm:$0xf0]  ;;  %v3716_v11 = vld [vmem:[#allocation5 + $0x6c4] sm:$0xf]  ;;  %v3190_v22 = vld [vmem:[#allocation5 + $0x638] sm:$0xf0]  ;;  %v3401_v27 = vor.u32 %v3750_v13, %v3398_v41 }
  0xf0   :  { %2092 = vmatpush.bf16.msra.mxu2 %v3001_v40  ;;  %v3289_v40 = vor.u32 %v3722_v17, %v3286_v20  ;;  %v3698_v17 = vld [vmem:[#allocation5 + $0x634] sm:$0xf]  ;;  %v3329_v20 = vor.u32 %v3732_v12, %v3326_v35  ;;  %v3238_v14 = vld [vmem:[#allocation5 + $0x698] sm:$0xf0]  ;;  %v3230_v12 = vld [vmem:[#allocation5 + $0x688] sm:$0xf0] }
  0xf1   :  { %2105 = vmatpush.bf16.msra.mxu3 %v3065_v43  ;;  %v3704_v43 = vld [vmem:[#allocation5 + $0x664] sm:$0xf]  ;;  %v3730_v34 = vld [vmem:[#allocation5 + $0x734] sm:$0xf] }
  0xf2   :  { %2117 = vmatpush.bf16.msrb.mxu0 %v3137_v51  ;;  %v3342_v51 = vld [vmem:[#allocation5 + $0x768] sm:$0xf0]  ;;  %v3724_v35 = vld [vmem:[#allocation5 + $0x704] sm:$0xf]  ;;  %v3758_v41 = vld [vmem:[#allocation5 + $0x814] sm:$0xf] }
  0xf3   :  { %2080 = vmatpush.bf16.msra.mxu1 %v2929_v53  ;;  %v3676_v53 = vld [vmem:[#allocation5 + $0x584] sm:$0xf]  ;;  %v3345_v60 = vor.u32 %v3736_v50, %v3342_v51  ;;  %v3310_v51 = vld [vmem:[#allocation5 + $0x728] sm:$0xf0] }
  0xf4   :  { %2093 = vmatpush.bf16.msra.mxu2 %v2993_v56  ;;  %v3414_v56 = vld [vmem:[#allocation5 + $0x7f8] sm:$0xf0]  ;;  %v3105_v61 = vor.u32 %v3676_v53, %v3102_v54  ;;  %v3728_v50 = vld [vmem:[#allocation5 + $0x724] sm:$0xf]  ;;  %v3746_v54 = vld [vmem:[#allocation5 + $0x7b4] sm:$0xf] }
  0xf5   :  { %2106 = vmatpush.bf16.msra.mxu3 %v3057_v57  ;;  %v3217_v57 = vor.u32 %v3704_v43, %v3214_v45  ;;  %v3417_v0 = vor.u32 %v3754_v55, %v3414_v56  ;;  %v3696_v45 = vld [vmem:[#allocation5 + $0x624] sm:$0xf]  ;;  %v3382_v55 = vld [vmem:[#allocation5 + $0x7b8] sm:$0xf0] }
  0xf6   :  { %2118 = vmatpush.bf16.msrb.mxu0 %v3129_v1  ;;  %v3734_v1 = vld [vmem:[#allocation5 + $0x754] sm:$0xf] }
  0xf7   :  { %2081 = vmatpush.bf16.msra.mxu1 %v2921_v19  ;;  %v3752_v19 = vld [vmem:[#allocation5 + $0x7e4] sm:$0xf] }
  0xf8   :  { %2094 = vmatpush.bf16.msra.mxu2 %v2985_v9  ;;  %v3700_v9 = vld [vmem:[#allocation5 + $0x644] sm:$0xf] }
  0xf9   :  { %2107 = vmatpush.bf16.msra.mxu3 %v3049_v44  ;;  %v3337_v44 = vor.u32 %v3734_v1, %v3334_v2  ;;  %v3201_v15 = vor.u32 %v3700_v9, %v3198_v10  ;;  %v1812_v1 = vadd.f32 %v4097_v18, %v4092_v4  ;;  %v3385_v2 = vor.u32 %v3746_v54, %v3382_v55  ;;  %v3692_v10 = vld [vmem:[#allocation5 + $0x604] sm:$0xf]  ;;  %v3294_v18 = vld [vmem:[#allocation5 + $0x708] sm:$0xf0] }
  0xfa   :  { %2119 = vmatpush.bf16.msrb.mxu0 %v3121_v16  ;;  %v3177_v9 = vor.u32 %v3694_v59, %v3174_v62  ;;  %v3761_v59 = vld [vmem:[%s4188_s3 + $0x8] sm:$0xff]  ;;  %v3760_v62 = vld [vmem:[%s4188_s3] sm:$0xff] }
  0xfb   :  { %2082 = vmatpush.bf16.msra.mxu1 %v2913_v24  ;;  %v4112_v21 = vpop.f32.mrf.mxu1  ;;  %v3714_v24 = vld [vmem:[#allocation5 + $0x6b4] sm:$0xf]  ;;  %v1825_v13 = vadd.f32 %v4100_v32, %v1812_v1 }
  0xfc   :  { %2095 = vmatpush.bf16.msra.mxu2 %v2977_v37  ;;  %v3318_v37 = vld [vmem:[#allocation5 + $0x738] sm:$0xf0]  ;;  %v3257_v43 = vor.u32 %v3714_v24, %v3254_v26 }
  0xfd   :  { %2108 = vmatpush.bf16.msra.mxu3 %v3041_v38  ;;  %v3748_v38 = vld [vmem:[#allocation5 + $0x7c4] sm:$0xf] }
  0xfe   :  { %2120 = vmatpush.bf16.msrb.mxu0 %v3113_v47  ;;  %2083 = vmatmul.bf16.vlgmr.msra.gmra.mxu1 %v4057_v25  ;;  %v3262_v25 = vld [vmem:[#allocation5 + $0x6c8] sm:$0xf0]  ;;  %v3712_v47 = vld [vmem:[#allocation5 + $0x6a4] sm:$0xf] }
  0xff   :  { %2127 = vmatpush.bf16.msrb.mxu1 %v3225_v8  ;;  %2096 = vmatmul.bf16.vlgmr.msra.gmra.mxu2 %v4061_v30  ;;  %v3409_v30 = vor.u32 %v3752_v19, %v3406_v7  ;;  %v3265_v16 = vor.u32 %v3716_v11, %v3262_v25  ;;  %v3390_v8 = vld [vmem:[#allocation5 + $0x7c8] sm:$0xf0]  ;;  %v3726_v19 = vld [vmem:[#allocation5 + $0x714] sm:$0xf]  ;;  %v3302_v7 = vld [vmem:[#allocation5 + $0x718] sm:$0xf0] }
 0x100   :  { %2140 = vmatpush.bf16.msrb.mxu2 %v3289_v40  ;;  %2109 = vmatmul.bf16.vlgmr.msra.gmra.mxu3 %v4059_v29  ;;  %v4109_v29 = vpop.f32.mrf.mxu0  ;;  %v3193_v40 = vor.u32 %v3698_v17, %v3190_v22  ;;  %v3393_v49 = vor.u32 %v3748_v38, %v3390_v8  ;;  %v3166_v11 = vld [vmem:[#allocation5 + $0x608] sm:$0xf0]  ;;  %v3305_v25 = vor.u32 %v3726_v19, %v3302_v7  ;;  %v3366_v17 = vld [vmem:[#allocation5 + $0x798] sm:$0xf0]  ;;  %v3767_v38 = vld [vmem:[%s4188_s3 + $0x38] sm:$0xff]  ;;  %v384_v7 = vperm.slane %v4088_v3, 1 }
 0x101   :  { %2153 = vmatpush.bf16.msrb.mxu3 %v3353_v46  ;;  %v3321_v46 = vor.u32 %v3730_v34, %v3318_v37  ;;  %v3169_v22 = vor.u32 %v3692_v10, %v3166_v11  ;;  %v1838_v37 = vadd.f32 %v4102_v48, %v1825_v13  ;;  %v3756_v8 = vld [vmem:[#allocation5 + $0x804] sm:$0xf]  ;;  %v3775_v3 = vld [vmem:[%s4188_s3 + $0x78] sm:$0xff] }
 0x102   :  { %2121 = vmatpush.bf16.msrb.mxu0 %v3105_v61  ;;  %v4114_v53 = vpop.f32.mrf.mxu2  ;;  %v3313_v61 = vor.u32 %v3728_v50, %v3310_v51  ;;  %v3763_v51 = vld [vmem:[%s4188_s3 + $0x18] sm:$0xff] }
 0x103   :  { %2128 = vmatpush.bf16.msrb.mxu1 %v3217_v57  ;;  %v4116_v56 = vpop.f32.mrf.mxu3 }
 0x104   :  { %2141 = vmatpush.bf16.msrb.mxu2 %v3281_v58  ;;  %v3249_v58 = vor.u32 %v3712_v47, %v3246_v42  ;;  %v3766_v47 = vld [vmem:[%s4188_s3 + $0x30] sm:$0xff] }
 0x105   :  { %2154 = vmatpush.bf16.msrb.mxu3 %v3345_v60  ;;  %2122 = vmatmul.bf16.vlgmr.msrb.gmra.mxu0 %v4063_v33  ;;  %v3182_v33 = vld [vmem:[#allocation5 + $0x628] sm:$0xf0] }
 0x106   :  { %2166 = vmatpush.bf16.msra.mxu0 %v3417_v0  ;;  %v3185_v57 = vor.u32 %v3696_v45, %v3182_v33  ;;  %v1878_v0 = vpop.f32.mrf.mxu1  ;;  %v3358_v45 = vld [vmem:[#allocation5 + $0x788] sm:$0xf0]  ;;  %v1851_v33 = vadd.f32 %v4104_v52, %v1838_v37  ;;  %v3765_v52 = vld [vmem:[%s4188_s3 + $0x28] sm:$0xff] }
 0x107   :  { %2129 = vmatpush.bf16.msrb.mxu1 %v3209_v5  ;;  %v3744_v5 = vld [vmem:[#allocation5 + $0x7a4] sm:$0xf] }
 0x108   :  { %2142 = vmatpush.bf16.msrb.mxu2 %v3273_v6  ;;  %v1865_v60 = vpop.f32.mrf.mxu0  ;;  %v3374_v6 = vld [vmem:[#allocation5 + $0x7a8] sm:$0xf0]  ;;  %v1864_v42 = vadd.f32 %v4109_v29, %v1851_v33 }
 0x109   :  { %2155 = vmatpush.bf16.msrb.mxu3 %v3337_v44  ;;  %v3241_v44 = vor.u32 %v3710_v63, %v3238_v14  ;;  %v3377_v4 = vor.u32 %v3744_v5, %v3374_v6 }
 0x10a   :  { %2167 = vmatpush.bf16.msra.mxu0 %v3409_v30  ;;  %v3708_v30 = vld [vmem:[#allocation5 + $0x684] sm:$0xf] }
 0x10b   :  { %2130 = vmatpush.bf16.msrb.mxu1 %v3201_v15  ;;  %v3430_v15 = vld [vmem:[#allocation5 + $0x818] sm:$0xf0]  ;;  %v3233_v24 = vor.u32 %v3708_v30, %v3230_v12  ;;  %v1904_v26 = vpop.f32.mrf.mxu3 }
 0x10c   :  { %2143 = vmatpush.bf16.msrb.mxu2 %v3265_v16  ;;  %v3742_v16 = vld [vmem:[#allocation5 + $0x794] sm:$0xf]  ;;  %v3433_v34 = vor.u32 %v3758_v41, %v3430_v15 }
 0x10d   :  { %2156 = vmatpush.bf16.msrb.mxu3 %v3329_v20  ;;  %v1891_v20 = vpop.f32.mrf.mxu2  ;;  %v3369_v32 = vor.u32 %v3742_v16, %v3366_v17 }
 0x10e   :  { %2168 = vmatpush.bf16.msra.mxu0 %v3401_v27  ;;  %v3297_v27 = vor.u32 %v3724_v35, %v3294_v18  ;;  %v3774_v20 = vld [vmem:[%s4188_s3 + $0x70] sm:$0xff] }
 0x10f   :  { %2131 = vmatpush.bf16.msrb.mxu1 %v3193_v40  ;;  %v3422_v40 = vld [vmem:[#allocation5 + $0x808] sm:$0xf0] }
 0x110   :  { %2144 = vmatpush.bf16.msrb.mxu2 %v3257_v43  ;;  %v3740_v43 = vld [vmem:[#allocation5 + $0x784] sm:$0xf] }
 0x111   :  { %2157 = vmatpush.bf16.msrb.mxu3 %v3321_v46  ;;  %v3425_v46 = vor.u32 %v3756_v8, %v3422_v40  ;;  %v3361_v48 = vor.u32 %v3740_v43, %v3358_v45 }
 0x112   :  { %2169 = vmatpush.bf16.msra.mxu0 %v3393_v49  ;;  %v1877_v49 = vadd.f32 %v4112_v21, %v1864_v42 }
 0x113   :  { %2132 = vmatpush.bf16.msrb.mxu1 %v3185_v57 }
 0x114   :  { %2145 = vmatpush.bf16.msrb.mxu2 %v3249_v58  ;;  %v1890_v50 = vadd.f32 %v4114_v53, %v1877_v49 }
 0x115   :  { %2158 = vmatpush.bf16.msrb.mxu3 %v3313_v61 }
 0x116   :  { %2170 = vmatpush.bf16.msra.mxu0 %v3385_v2  ;;  %v1903_v29 = vadd.f32 %v4116_v56, %v1890_v50  ;;  %v3768_v50 = vld [vmem:[%s4188_s3 + $0x40] sm:$0xff] }
 0x117   :  { %2133 = vmatpush.bf16.msrb.mxu1 %v3177_v9 }
 0x118   :  { %2146 = vmatpush.bf16.msrb.mxu2 %v3241_v44 }
 0x119   :  { %2159 = vmatpush.bf16.msrb.mxu3 %v3305_v25 }
 0x11a   :  { %2171 = vmatpush.bf16.msra.mxu0 %v3377_v4 }
 0x11b   :  { %2134 = vmatpush.bf16.msrb.mxu1 %v3169_v22 }
 0x11c   :  { %2147 = vmatpush.bf16.msrb.mxu2 %v3233_v24 }
 0x11d   :  { %2160 = vmatpush.bf16.msrb.mxu3 %v3297_v27  ;;  %v3773_v27 = vld [vmem:[%s4188_s3 + $0x68] sm:$0xff] }
 0x11e   :  { %2172 = vmatpush.bf16.msra.mxu0 %v3369_v32  ;;  %2135 = vmatmul.bf16.vlgmr.msrb.gmra.mxu1 %v4071_v28  ;;  %v3764_v28 = vld [vmem:[%s4188_s3 + $0x20] sm:$0xff]  ;;  %v3771_v32 = vld [vmem:[%s4188_s3 + $0x58] sm:$0xff] }
 0x11f   :  { %2185 = vmatpush.bf16.msra.mxu1 %v3433_v34  ;;  %2148 = vmatmul.bf16.vlgmr.msrb.gmra.mxu2 %v4073_v31  ;;  %v1915_v31 = vpop.f32.mrf.mxu0  ;;  %v3772_v34 = vld [vmem:[%s4188_s3 + $0x60] sm:$0xff] }
 0x120   :  { %2332 = vmatpush.bf16.msra.mxu2 %v3767_v38  ;;  %2161 = vmatmul.bf16.vlgmr.msrb.gmra.mxu3 %v4069_v23  ;;  %v1928_v23 = vpop.f32.mrf.mxu1  ;;  %v1916_v54 = vadd.f32 %v1915_v31, %v1903_v29 }
 0x121   :  { %2345 = vmatpush.bf16.msra.mxu3 %v3775_v3 }
 0x122   :  { %2173 = vmatpush.bf16.msra.mxu0 %v3361_v48  ;;  %v1941_v21 = vpop.f32.mrf.mxu2  ;;  %v1929_v58 = vadd.f32 %v1928_v23, %v1916_v54  ;;  %v3769_v48 = vld [vmem:[%s4188_s3 + $0x48] sm:$0xff] }
 0x123   :  { %2186 = vmatpush.bf16.msra.mxu1 %v3425_v46  ;;  %v1954_v55 = vpop.f32.mrf.mxu3  ;;  %v3770_v46 = vld [vmem:[%s4188_s3 + $0x50] sm:$0xff] }
 0x124   :  { %2333 = vmatpush.bf16.msra.mxu2 %v3766_v47  ;;  %v1942_v56 = vadd.f32 %v1941_v21, %v1929_v58 }
 0x125   :  { %2174 = vmatmul.bf16.vlgmr.msra.gmra.mxu0 %v4075_v36  ;;  %v3762_v36 = vld [vmem:[%s4188_s3 + $0x10] sm:$0xff]  ;;  %2346 = vmatpush.bf16.msra.mxu3 %v3774_v20  ;;  %s3974_s3 = smov [#allocation13]  }
 0x126   :  { %v1955_v61 = vadd.f32 %v1954_v55, %v1942_v56  ;;  %s2379_s30 = sshll.u32 %s3974_s3, 4  ;;  %s2380_s30 = int_to_ptr.vmem [resolvable:$true] %s2379_s30 }
 0x127   :  { %v1917_v53 = vpop.f32.mrf.mxu0 }
 0x128   :  { %2334 = vmatpush.bf16.msra.mxu2 %v3765_v52  ;;  %v1930_v57 = vpop.f32.mrf.mxu1 }
 0x129   :  { %2347 = vmatpush.bf16.msra.mxu3 %v3773_v27 }
 0x12a   :  { %v1943_v60 = vpop.f32.mrf.mxu2 }
 0x12b   :  { %v1956_v63 = vpop.f32.mrf.mxu3 }
 0x12c   :  { %2335 = vmatpush.bf16.msra.mxu2 %v3764_v28 }
 0x12d   :  { %2348 = vmatpush.bf16.msra.mxu3 %v3772_v34 }
 0x12e   :  { %3435 = vmatmul.msk.bf16.vlgmr.msra.gmra.mxu1 %vm1746_vm0, %v4081_v39 }
 0x12f   :  { %v1967_v14 = vpop.f32.mrf.mxu0 }
 0x130   :  { %2336 = vmatpush.bf16.msra.mxu2 %v3763_v51  ;;  %v1968_v0 = vadd.f32 %v1967_v14, %v1955_v61 }
 0x131   :  { %2349 = vmatpush.bf16.msra.mxu3 %v3771_v32 }
 0x132   :  { %vm2192_vm1 = vcmp.gt.f32.partialorder %v1968_v0, 0.0  ;;  %v2194_v39 = vmul.f32 0.01, %v1968_v0 }
 0x134   :  { %2337 = vmatpush.bf16.msra.mxu2 %v3762_v36  ;;  %v2196_v1 = vsel %vm2192_vm1, %v1968_v0, %v2194_v39 }
 0x135   :  { %v2198_v2 = vpack.c.bf16 %v2196_v1, %v2196_v1  ;;  %2350 = vmatpush.bf16.msra.mxu3 %v3770_v46 }
 0x137   :  { %v1969_v19 = vpop.f32.mrf.mxu0 }
 0x138   :  { %2338 = vmatpush.bf16.msra.mxu2 %v3761_v59 }
 0x139   :  { %2351 = vmatpush.bf16.msra.mxu3 %v3769_v48 }
 0x13b   :  { %v1980_v5 = vpop.f32.mrf.mxu1 }
 0x13c   :  { %2339 = vmatpush.bf16.msra.mxu2 %v3760_v62  ;;  %v1981_v6 = vadd.f32 %v1980_v5, %v384_v7  ;;  %v3785_v5 = vld [vmem:[#allocation8] ss:$0 sm:$0xff] }
 0x13d   :  { %2352 = vmatpush.bf16.msra.mxu3 %v3768_v50 }
 0x13f   :  { %2340 = vmatmul.bf16.vlgmr.msra.gmra.mxu2 %v2198_v2 }
 0x142   :  { %v1993_v9 = vpop.f32.mrf.mxu2  ;;  %v2019_v11 = vpop.f32.mrf.mxu0 }
 0x143   :  { %v1994_v44 = vadd.f32 %v1993_v9, %v1981_v6  ;;  %v2006_v10 = vpop.f32.mrf.mxu3  ;;  %v1982_v25 = vpop.f32.mrf.mxu1 }
 0x144   :  { %v3787_v25 = vld [vmem:[#allocation11] ss:$0 sm:$0xff] }
 0x145   :  { %v2007_v30 = vadd.f32 %v2006_v10, %v1994_v44  ;;  %v3786_v10 = vld [vmem:[#allocation10] ss:$0 sm:$0xff] }
 0x147   :  { %v2020_v12 = vadd.f32 %v2019_v11, %v2007_v30 }
 0x14a   :  { %v1995_v35 = vpop.f32.mrf.mxu2  ;;  %v2021_v4 = vpop.f32.mrf.mxu0 }
 0x14b   :  { %v2008_v13 = vpop.f32.mrf.mxu3 }
 0x15b   :  { %v2032_v18 = vpop.f32.mrf.mxu1 }
 0x15c   :  { %v2033_v43 = vadd.f32 %v2032_v18, %v2020_v12 }
 0x162   :  { %v2045_v41 = vpop.f32.mrf.mxu2  ;;  %v2071_v16 = vpop.f32.mrf.mxu0 }
 0x163   :  { %v2058_v15 = vpop.f32.mrf.mxu3  ;;  %v2034_v17 = vpop.f32.mrf.mxu1  ;;  %v2046_v33 = vadd.f32 %v2045_v41, %v2033_v43 }
 0x165   :  { %v2059_v49 = vadd.f32 %v2058_v15, %v2046_v33 }
 0x167   :  { %v2072_v28 = vadd.f32 %v2071_v16, %v2059_v49 }
 0x16a   :  { %v2047_v22 = vpop.f32.mrf.mxu2  ;;  %v2073_v26 = vpop.f32.mrf.mxu0 }
 0x16b   :  { %v2060_v24 = vpop.f32.mrf.mxu3 }
 0x17b   :  { %v2084_v37 = vpop.f32.mrf.mxu1 }
 0x17c   :  { %v2085_v31 = vadd.f32 %v2084_v37, %v2072_v28 }
 0x182   :  { %v2097_v38 = vpop.f32.mrf.mxu2  ;;  %v2123_v40 = vpop.f32.mrf.mxu0 }
 0x183   :  { %v2110_v8 = vpop.f32.mrf.mxu3  ;;  %v2086_v45 = vpop.f32.mrf.mxu1  ;;  %v2098_v23 = vadd.f32 %v2097_v38, %v2085_v31 }
 0x185   :  { %v2111_v29 = vadd.f32 %v2110_v8, %v2098_v23 }
 0x187   :  { %v2124_v54 = vadd.f32 %v2123_v40, %v2111_v29 }
 0x18a   :  { %v2099_v47 = vpop.f32.mrf.mxu2  ;;  %v2125_v52 = vpop.f32.mrf.mxu0 }
 0x18b   :  { %v2112_v42 = vpop.f32.mrf.mxu3 }
 0x19b   :  { %v2136_v51 = vpop.f32.mrf.mxu1 }
 0x19c   :  { %v2137_v21 = vadd.f32 %v2136_v51, %v2124_v54 }
 0x1a2   :  { %v2149_v55 = vpop.f32.mrf.mxu2  ;;  %v2175_v36 = vpop.f32.mrf.mxu0 }
 0x1a3   :  { %v2150_v53 = vadd.f32 %v2149_v55, %v2137_v21  ;;  %v2162_v57 = vpop.f32.mrf.mxu3  ;;  %v2138_v58 = vpop.f32.mrf.mxu1 }
 0x1a5   :  { %v2163_v56 = vadd.f32 %v2162_v57, %v2150_v53 }
 0x1a7   :  { %v2176_v61 = vadd.f32 %v2175_v36, %v2163_v56 }
 0x1aa   :  { %v2151_v59 = vpop.f32.mrf.mxu2  ;;  %v2177_v60 = vpop.f32.mrf.mxu0 }
 0x1ab   :  { %v2164_v62 = vpop.f32.mrf.mxu3  ;;  %v2188_v63 = vpop.f32.mrf.mxu1 }
 0x1ac   :  { %v2189_v14 = vadd.f32 %v2188_v63, %v2176_v61 }
 0x1ae   :  { %vm2193_vm2 = vcmp.gt.f32.partialorder %v2189_v14, 0.0  ;;  %v2195_v0 = vmul.f32 0.01, %v2189_v14 }
 0x1b0   :  { %v2197_v39 = vsel %vm2193_vm2, %v2189_v14, %v2195_v0 }
 0x1b1   :  { %v2199_v1 = vpack.c.bf16 %v2197_v39, %v2197_v39 }
 0x1b3   :  { %v2190_v2 = vpop.f32.mrf.mxu1  ;;  %2353 = vmatmul.bf16.vlgmr.msra.gmra.mxu3 %v2199_v1 }
 0x1c2   :  { %v2341_v19 = vpop.f32.mrf.mxu2 }
 0x1c3   :  { %v2342_v6 = vadd.f32 %v3785_v5, %v2341_v19 }
 0x1ca   :  { %v2343_v7 = vpop.f32.mrf.mxu2 }
 0x236   :  { %v2354_v9 = vpop.f32.mrf.mxu3 }
 0x237   :  { %v2355_v44 = vadd.f32 %v2354_v9, %v2342_v6 }
 0x239   :  { %vm2358_vm3 = vcmp.gt.f32.partialorder %v2355_v44, 0.0  ;;  %v2359_v11 = vmul.f32 0.01, %v2355_v44 }
 0x23b   :  { %v2360_v30 = vsel %vm2358_vm3, %v2355_v44, %v2359_v11 }
 0x23c   :  { %v2365_v12 = vmul.f32 %v3786_v10, %v2360_v30 }
 0x23e   :  { %v2370_v35 = vadd.f32 %v3787_v25, %v2365_v12  ;;  %v2356_v13 = vpop.f32.mrf.mxu3 }
 0x240   :  { %v2371_v4 = vpack.c.bf16 %v2370_v35, %v2370_v35 }
 0x242   :  { %2373 = vst.msk [vmem:[#allocation13] sm:$0xf] %vm2372_vm4, %v2371_v4 }
 0x243   :  { %2384 = dma.vmem_to_hbm [thread:$0]  %s2380_s30, 64, %s2382_s10, [#allocation4]  }
 0x244   :  { %3964 = dma.done.wait [#allocation4], 64  }
 0x245   :  { %3965 = vsyncadd [#allocation4], 4294967232 }
 0x246   :  { %2389 = vsyncpa [#allocation3], 1 }
 0x247   :  { %2390 = vsyncpa [#allocation6], 1 }
 0x248   :  { %2391 = vsyncpa [#allocation9], 1 }
 0x249   :  { %2392 = vsyncpa [#allocation12], 1 }
 0x24a   :  { %2393 = vsyncpa [#allocation4], 1 }

</bundles_post_ra>
